<compile_context>
chip_gen: v6e
topology: v6e:2x2x1
jax: 0.10.0
libtpu: 0.0.40
codegen_flags: <defaults>
</compile_context>

<pallas_src>
import math

import jax
import jax.numpy as jnp
from jax.experimental import pallas as pl
from jax.experimental.pallas import tpu as pltpu

# ----------------------------- configuration -------------------------------
D_IN = 3          # xyz points
D_OUT = 16        # feature output width of the last layer
D_SDF = 1         # sdf head width
D_HIDDEN = 32
N_LAYERS = 6
SKIP_IN = (4,)
BIAS = 0.5
SCALE = 1.0
INSIDE_OUTSIDE = False

DIMS = [D_IN] + [D_HIDDEN for _ in range(N_LAYERS)] + [D_OUT]
NUM_LAYERS = len(DIMS)          # = N_LAYERS + 2
N_LIN = NUM_LAYERS - 1          # number of lin{l} layers (l = 0 .. N_LIN-1)

INV_SQRT2 = 1.0 / math.sqrt(2.0)
D_LAST = 24                     # fused (sdf + feature) head rows, 17 padded to 24


# --------------------------- parameter creation -----------------------------
def init_params(key):
    """Deterministic geometric init. Weights in PyTorch layout (out, in), bias (out,)."""
    params = []
    for l in range(N_LIN):
        in_dim = DIMS[l]
        out_dim = DIMS[l + 1] - DIMS[0] if (l + 1) in SKIP_IN else DIMS[l + 1]
        key, wk = jax.random.split(key)
        if l == NUM_LAYERS - 2:
            mean = math.sqrt(math.pi) / math.sqrt(in_dim)
            if INSIDE_OUTSIDE:
                mean = -mean
            w = mean + 1e-4 * jax.random.normal(wk, (out_dim, in_dim), jnp.float32)
            b = jnp.full((out_dim,), BIAS if INSIDE_OUTSIDE else -BIAS, jnp.float32)
        else:
            std = math.sqrt(2.0) / math.sqrt(out_dim)
            w = std * jax.random.normal(wk, (out_dim, in_dim), jnp.float32)
            b = jnp.zeros((out_dim,), jnp.float32)
        params.append((w, b))

    # sdf_linear head: dims[-2] -> d_sdf
    key, wk = jax.random.split(key)
    mean = math.sqrt(math.pi) / math.sqrt(DIMS[-2])
    if INSIDE_OUTSIDE:
        mean = -mean
    w_sdf = mean + 1e-4 * jax.random.normal(wk, (D_SDF, DIMS[-2]), jnp.float32)
    b_sdf = jnp.full((D_SDF,), BIAS if INSIDE_OUTSIDE else -BIAS, jnp.float32)
    params.append((w_sdf, b_sdf))
    return params


def _pad2(a, rows, cols):
    return jnp.pad(a, ((0, rows - a.shape[0]), (0, cols - a.shape[1])))


def pack_params(params, scale=SCALE):
    """Pack the 8 linears for the kernel.

    Returns:
      w_mm   (5, 32, 32) bf16 : MXU weights for layers 1,2,3, layer4-x/sqrt2, 5.
      w_last (24, 32)    bf16 : fused last layer [w_sdf/scale ; w6], 17 rows padded to 24.
      w_fma  (2, 32, 32)  f32 : cols 0..2 hold [w0*scale, w4_input*scale/sqrt2] (VPU FMAs).
      b_hid  (6, 32, 1)   f32 : biases b0..b5 (b3 zero-padded from 29 to 32 rows).
      b_last (24, 1)      f32 : fused last bias [b_sdf/scale ; b6] padded to 24.

    Zero padding is safe: padded activation rows 29..31 of the layer-3 output
    hit zero-padded columns 29..31 of the layer-4 weight, so they never
    contaminate real outputs.
    """
    (w0, b0), (w1, b1), (w2, b2), (w3, b3), (w4, b4), (w5, b5), (w6, b6), (ws, bs) = params
    x_dim = DIMS[SKIP_IN[0]] - DIMS[0]          # 29 channels of x entering the skip concat
    w4_x = w4[:, :x_dim] * INV_SQRT2            # (32, 29)
    w4_i = w4[:, x_dim:] * (INV_SQRT2 * scale)  # (32, 3), fold input scale + 1/sqrt2
    w67 = jnp.concatenate([ws / scale, w6], axis=0)   # (17, 32) fused sdf+feature head
    b67 = jnp.concatenate([bs / scale, b6], axis=0)   # (17,)

    H = D_HIDDEN
    w_mm = jnp.stack([_pad2(w1, H, H), _pad2(w2, H, H), _pad2(w3, H, H),
                      _pad2(w4_x, H, H), _pad2(w5, H, H)]).astype(jnp.bfloat16)      # (5,32,32)
    w_last = _pad2(w67, D_LAST, H).astype(jnp.bfloat16)                               # (24,32)
    w_fma = jnp.stack([_pad2(w0 * scale, H, H),
                       _pad2(w4_i, H, H)]).astype(jnp.float32)                        # (2,32,32)
    b_hid = jnp.stack([b0, b1, b2, jnp.pad(b3, (0, H - b3.shape[0])), b4, b5]
                      ).astype(jnp.float32)[..., None]                                # (6,32,1)
    b_last = jnp.pad(b67, (0, D_LAST - b67.shape[0])).astype(jnp.float32)[..., None]  # (24,1)
    return w_mm, w_last, w_fma, b_hid, b_last


# ------------------------------- kernel -------------------------------------
def _softplus_beta100(x):
    # PyTorch nn.Softplus(beta=100, threshold=20): linear once beta*x > 20.
    # Kept in f32 on purpose (v5e has no bf16 EUP/VPU; accuracy of the sdf row).
    z = 100.0 * x
    sp = jnp.log1p(jnp.exp(jnp.minimum(z, 20.0))) * (1.0 / 100.0)
    return jnp.where(z > 20.0, x, sp)


def sdf_kernel(x_ref, wmm_ref, wlast_ref, wfma_ref, bhid_ref, blast_ref, out_ref):
    """x_ref: (3, T) f32; wmm_ref: (5,32,32) bf16; wlast_ref: (24,32) bf16;
    wfma_ref: (2,32,32) f32; bhid_ref: (6,32,1) f32; blast_ref: (24,1) f32;
    out_ref: (17, T) f32.  Points live on the 128-wide lane axis."""
    inp = x_ref[...]                                      # (3, T); scale folded into weights

    # layer 0 (K = 3): three VPU broadcast-FMAs instead of a tiny MXU matmul.
    w0 = wfma_ref[0]
    h = (w0[:, 0:1] * inp[0:1, :]
         + w0[:, 1:2] * inp[1:2, :]
         + w0[:, 2:3] * inp[2:3, :]
         + bhid_ref[0])
    x = _softplus_beta100(h).astype(jnp.bfloat16)

    # layers 1..3: bf16 MXU matmuls with f32 accumulation.
    for l in (1, 2, 3):
        h = jnp.dot(wmm_ref[l - 1], x, preferred_element_type=jnp.float32) + bhid_ref[l]
        x = _softplus_beta100(h).astype(jnp.bfloat16)

    # layer 4: skip connection cat([x, inp], 1)/sqrt(2) as a split matmul.
    # Matmul part uses pre-scaled (1/sqrt2) weights; the 3-wide input part is FMAs.
    w4i = wfma_ref[1]
    h = (jnp.dot(wmm_ref[3], x, preferred_element_type=jnp.float32)
         + w4i[:, 0:1] * inp[0:1, :]
         + w4i[:, 1:2] * inp[1:2, :]
         + w4i[:, 2:3] * inp[2:3, :]
         + bhid_ref[4])
    x = _softplus_beta100(h).astype(jnp.bfloat16)

    # layer 5
    h = jnp.dot(wmm_ref[4], x, preferred_element_type=jnp.float32) + bhid_ref[5]
    x = _softplus_beta100(h).astype(jnp.bfloat16)

    # layer 6 fused with sdf head (24 padded rows): row 0 = sdf/scale,
    # rows 1..16 = features (no activation).
    y = jnp.dot(wlast_ref[...], x, preferred_element_type=jnp.float32) + blast_ref[...]
    out_ref[...] = y[: 1 + D_OUT, :]


# ------------------------------ wrapper --------------------------------------
def _pick_tile_n(n, max_tile=1024, min_tile=256, target_steps=8):
    """Lane-tile size: large enough to amortize the ~0.35us grid-step overhead,
    small enough to keep activation vregs in check, and chosen so the grid keeps
    >= 2 (ideally >= 8) steps so "parallel" feeds both v7x TensorCores."""
    tile = -(-n // target_steps)              # cdiv
    tile = -(-tile // 128) * 128              # round up to lane width
    return int(max(min_tile, min(max_tile, tile)))


def sdf_network_forward(x, packed, tile_n=None):
    """x: (N, D_IN) float32; returns (N, 1 + D_OUT) = cat([sdf/scale, feat], -1)."""
    w_mm, w_last, w_fma, b_hid, b_last = packed
    N = x.shape[0]
    if tile_n is None:
        tile_n = _pick_tile_n(N)
    n_tiles = pl.cdiv(N, tile_n)

    # Points on the lane axis; no explicit padding — Pallas masks the ragged
    # last block (garbage input lanes cannot cross lanes: the contraction is
    # over the channel/sublane axis; OOB output stores are masked).
    xt = x.T                                               # (3, N)

    out_t = pl.pallas_call(
        sdf_kernel,
        out_shape=jax.ShapeDtypeStruct((1 + D_OUT, N), jnp.float32),
        grid=(n_tiles,),
        in_specs=[
            pl.BlockSpec((D_IN, tile_n), lambda i: (0, i)),
            pl.BlockSpec(w_mm.shape, lambda i: (0, 0, 0)),
            pl.BlockSpec(w_last.shape, lambda i: (0, 0)),
            pl.BlockSpec(w_fma.shape, lambda i: (0, 0, 0)),
            pl.BlockSpec(b_hid.shape, lambda i: (0, 0, 0)),
            pl.BlockSpec(b_last.shape, lambda i: (0, 0)),
        ],
        out_specs=pl.BlockSpec((1 + D_OUT, tile_n), lambda i: (0, i)),
        compiler_params=pltpu.CompilerParams(
            dimension_semantics=("parallel",)),
    )(xt, w_mm, w_last, w_fma, b_hid, b_last)

    # Keep the module's (N, 17) contract; a consumer that accepts (17, N) can
    # drop this transpose entirely.
    return out_t.T


# --------------------------- pure-JAX reference ------------------------------
def reference_forward(x, params):
    hi = jax.lax.Precision.HIGHEST
    inp = x * SCALE
    h = inp
    sdf_out = None
    for l in range(N_LIN):
        w, b = params[l]
        if l in SKIP_IN:
            h = jnp.concatenate([h, inp], axis=1) / math.sqrt(2.0)
        if l == NUM_LAYERS - 2:
            w_s, b_s = params[N_LIN]
            sdf_out = jnp.dot(h, w_s.T, precision=hi) + b_s
        h = jnp.dot(h, w.T, precision=hi) + b
        if l < NUM_LAYERS - 2:
            h = _softplus_beta100(h)
    return jnp.concatenate([sdf_out[:, :1] / SCALE, h], axis=-1)


# -------------------------------- main ---------------------------------------
if __name__ == "__main__":
    key = jax.random.PRNGKey(0)
    pkey, xkey = jax.random.split(key)

    params = init_params(pkey)
    packed = pack_params(params)

    N = 1000                                   # not a multiple of tile_n -> exercises ragged tile
    x = jax.random.normal(xkey, (N, D_IN), jnp.float32)

    forward = jax.jit(sdf_network_forward, static_argnames=("tile_n",))
    out = jax.block_until_ready(forward(x, packed))
    ref = jax.block_until_ready(reference_forward(x, params))

    assert out.shape == (N, 1 + D_OUT), out.shape
    # Tolerance covers bf16 matmul-operand rounding across the 7 layers (f32
    # accumulation, f32 softplus); genuine layout/ordering bugs give O(0.3+) errors.
    max_err = float(jnp.max(jnp.abs(out - ref)))
    assert jnp.allclose(out, ref, atol=5e-2, rtol=5e-2), f"mismatch vs reference: {max_err}"

    print("KERNEL_OK")
</pallas_src>

<mosaic_0001>
module attributes {stable_mosaic.version = 11 : i64} {
  func.func @sdf_kernel(%arg0: i32, %arg1: memref<3x256xf32, #tpu.memory_space<vmem>>, %arg2: memref<5x32x32xbf16, #tpu.memory_space<vmem>>, %arg3: memref<24x32xbf16, #tpu.memory_space<vmem>>, %arg4: memref<2x32x32xf32, #tpu.memory_space<vmem>>, %arg5: memref<6x32x1xf32, #tpu.memory_space<vmem>>, %arg6: memref<24x1xf32, #tpu.memory_space<vmem>>, %arg7: memref<17x256xf32, #tpu.memory_space<vmem>>) attributes {dimension_semantics = [#tpu.dimension_semantics<parallel>], iteration_bounds = array<i64: 4>, scalar_prefetch = 0 : i64, scratch_operands = 0 : i64, tpu.core_type = #tpu.core_type<tc>, window_params = [{transform_indices = @transform_0, window_bounds = array<i64: 3, 256>}, {pipeline_mode = #tpu.pipeline_mode<synchronous>, transform_indices = @transform_1, window_bounds = array<i64: 5, 32, 32>}, {pipeline_mode = #tpu.pipeline_mode<synchronous>, transform_indices = @transform_2, window_bounds = array<i64: 24, 32>}, {pipeline_mode = #tpu.pipeline_mode<synchronous>, transform_indices = @transform_3, window_bounds = array<i64: 2, 32, 32>}, {pipeline_mode = #tpu.pipeline_mode<synchronous>, transform_indices = @transform_4, window_bounds = array<i64: 6, 32, 1>}, {pipeline_mode = #tpu.pipeline_mode<synchronous>, transform_indices = @transform_5, window_bounds = array<i64: 24, 1>}, {transform_indices = @transform_6, window_bounds = array<i64: 17, 256>}]} {
    %c0 = arith.constant 0 : index
    %c0_0 = arith.constant 0 : index
    %0 = vector.load %arg1[%c0, %c0_0] : memref<3x256xf32, #tpu.memory_space<vmem>>, vector<3x256xf32>
    %c0_1 = arith.constant 0 : index
    %c0_2 = arith.constant 0 : index
    %c0_3 = arith.constant 0 : index
    %1 = vector.load %arg4[%c0_1, %c0_2, %c0_3] : memref<2x32x32xf32, #tpu.memory_space<vmem>>, vector<1x32x32xf32>
    %2 = vector.shape_cast %1 : vector<1x32x32xf32> to vector<32x32xf32>
    %3 = vector.extract_strided_slice %2 {offsets = [0, 0], sizes = [32, 1], strides = [1, 1]} : vector<32x32xf32> to vector<32x1xf32>
    %4 = vector.extract_strided_slice %0 {offsets = [0, 0], sizes = [1, 256], strides = [1, 1]} : vector<3x256xf32> to vector<1x256xf32>
    %5 = vector.broadcast %3 : vector<32x1xf32> to vector<32x256xf32>
    %6 = vector.broadcast %4 : vector<1x256xf32> to vector<32x256xf32>
    %7 = arith.mulf %5, %6 : vector<32x256xf32>
    %8 = vector.extract_strided_slice %2 {offsets = [0, 1], sizes = [32, 1], strides = [1, 1]} : vector<32x32xf32> to vector<32x1xf32>
    %9 = vector.extract_strided_slice %0 {offsets = [1, 0], sizes = [1, 256], strides = [1, 1]} : vector<3x256xf32> to vector<1x256xf32>
    %10 = vector.broadcast %8 : vector<32x1xf32> to vector<32x256xf32>
    %11 = vector.broadcast %9 : vector<1x256xf32> to vector<32x256xf32>
    %12 = arith.mulf %10, %11 : vector<32x256xf32>
    %13 = arith.addf %7, %12 : vector<32x256xf32>
    %14 = vector.extract_strided_slice %2 {offsets = [0, 2], sizes = [32, 1], strides = [1, 1]} : vector<32x32xf32> to vector<32x1xf32>
    %15 = vector.extract_strided_slice %0 {offsets = [2, 0], sizes = [1, 256], strides = [1, 1]} : vector<3x256xf32> to vector<1x256xf32>
    %16 = vector.broadcast %14 : vector<32x1xf32> to vector<32x256xf32>
    %17 = vector.broadcast %15 : vector<1x256xf32> to vector<32x256xf32>
    %18 = arith.mulf %16, %17 : vector<32x256xf32>
    %19 = arith.addf %13, %18 : vector<32x256xf32>
    %c0_4 = arith.constant 0 : index
    %c0_5 = arith.constant 0 : index
    %c0_6 = arith.constant 0 : index
    %20 = vector.load %arg5[%c0_4, %c0_5, %c0_6] : memref<6x32x1xf32, #tpu.memory_space<vmem>>, vector<1x32x1xf32>
    %21 = vector.shape_cast %20 : vector<1x32x1xf32> to vector<32x1xf32>
    %22 = vector.broadcast %21 : vector<32x1xf32> to vector<32x256xf32>
    %23 = arith.addf %19, %22 : vector<32x256xf32>
    %cst = arith.constant 1.000000e+02 : f32
    %24 = vector.broadcast %cst : f32 to vector<32x256xf32>
    %25 = arith.mulf %24, %23 : vector<32x256xf32>
    %cst_7 = arith.constant 2.000000e+01 : f32
    %26 = vector.broadcast %cst_7 : f32 to vector<32x256xf32>
    %27 = arith.minimumf %25, %26 : vector<32x256xf32>
    %28 = math.exp %27 : vector<32x256xf32>
    %29 = math.log1p %28 : vector<32x256xf32>
    %cst_8 = arith.constant 0.00999999977 : f32
    %30 = vector.broadcast %cst_8 : f32 to vector<32x256xf32>
    %31 = arith.mulf %29, %30 : vector<32x256xf32>
    %cst_9 = arith.constant 2.000000e+01 : f32
    %32 = vector.broadcast %cst_9 : f32 to vector<32x256xf32>
    %33 = arith.cmpf ogt, %25, %32 : vector<32x256xf32>
    %34 = arith.select %33, %23, %31 : vector<32x256xi1>, vector<32x256xf32>
    %35 = arith.truncf %34 : vector<32x256xf32> to vector<32x256xbf16>
    %c0_10 = arith.constant 0 : index
    %c0_11 = arith.constant 0 : index
    %c0_12 = arith.constant 0 : index
    %36 = vector.load %arg2[%c0_10, %c0_11, %c0_12] : memref<5x32x32xbf16, #tpu.memory_space<vmem>>, vector<1x32x32xbf16>
    %37 = vector.shape_cast %36 : vector<1x32x32xbf16> to vector<32x32xbf16>
    %cst_13 = arith.constant dense<0.000000e+00> : vector<32x256xf32>
    %38 = tpu.matmul %37, %35, %cst_13 {dimension_numbers = #tpu.dot_dimension_numbers<[1], [0], [0], [1], [0, 0, 1, 1], [], []>} : vector<32x32xbf16>, vector<32x256xbf16>, vector<32x256xf32> -> vector<32x256xf32>
    %c1 = arith.constant 1 : index
    %c0_14 = arith.constant 0 : index
    %c0_15 = arith.constant 0 : index
    %39 = vector.load %arg5[%c1, %c0_14, %c0_15] : memref<6x32x1xf32, #tpu.memory_space<vmem>>, vector<1x32x1xf32>
    %40 = vector.shape_cast %39 : vector<1x32x1xf32> to vector<32x1xf32>
    %41 = vector.broadcast %40 : vector<32x1xf32> to vector<32x256xf32>
    %42 = arith.addf %38, %41 : vector<32x256xf32>
    %cst_16 = arith.constant 1.000000e+02 : f32
    %43 = vector.broadcast %cst_16 : f32 to vector<32x256xf32>
    %44 = arith.mulf %43, %42 : vector<32x256xf32>
    %cst_17 = arith.constant 2.000000e+01 : f32
    %45 = vector.broadcast %cst_17 : f32 to vector<32x256xf32>
    %46 = arith.minimumf %44, %45 : vector<32x256xf32>
    %47 = math.exp %46 : vector<32x256xf32>
    %48 = math.log1p %47 : vector<32x256xf32>
    %cst_18 = arith.constant 0.00999999977 : f32
    %49 = vector.broadcast %cst_18 : f32 to vector<32x256xf32>
    %50 = arith.mulf %48, %49 : vector<32x256xf32>
    %cst_19 = arith.constant 2.000000e+01 : f32
    %51 = vector.broadcast %cst_19 : f32 to vector<32x256xf32>
    %52 = arith.cmpf ogt, %44, %51 : vector<32x256xf32>
    %53 = arith.select %52, %42, %50 : vector<32x256xi1>, vector<32x256xf32>
    %54 = arith.truncf %53 : vector<32x256xf32> to vector<32x256xbf16>
    %c1_20 = arith.constant 1 : index
    %c0_21 = arith.constant 0 : index
    %c0_22 = arith.constant 0 : index
    %55 = vector.load %arg2[%c1_20, %c0_21, %c0_22] : memref<5x32x32xbf16, #tpu.memory_space<vmem>>, vector<1x32x32xbf16>
    %56 = vector.shape_cast %55 : vector<1x32x32xbf16> to vector<32x32xbf16>
    %cst_23 = arith.constant dense<0.000000e+00> : vector<32x256xf32>
    %57 = tpu.matmul %56, %54, %cst_23 {dimension_numbers = #tpu.dot_dimension_numbers<[1], [0], [0], [1], [0, 0, 1, 1], [], []>} : vector<32x32xbf16>, vector<32x256xbf16>, vector<32x256xf32> -> vector<32x256xf32>
    %c2 = arith.constant 2 : index
    %c0_24 = arith.constant 0 : index
    %c0_25 = arith.constant 0 : index
    %58 = vector.load %arg5[%c2, %c0_24, %c0_25] : memref<6x32x1xf32, #tpu.memory_space<vmem>>, vector<1x32x1xf32>
    %59 = vector.shape_cast %58 : vector<1x32x1xf32> to vector<32x1xf32>
    %60 = vector.broadcast %59 : vector<32x1xf32> to vector<32x256xf32>
    %61 = arith.addf %57, %60 : vector<32x256xf32>
    %cst_26 = arith.constant 1.000000e+02 : f32
    %62 = vector.broadcast %cst_26 : f32 to vector<32x256xf32>
    %63 = arith.mulf %62, %61 : vector<32x256xf32>
    %cst_27 = arith.constant 2.000000e+01 : f32
    %64 = vector.broadcast %cst_27 : f32 to vector<32x256xf32>
    %65 = arith.minimumf %63, %64 : vector<32x256xf32>
    %66 = math.exp %65 : vector<32x256xf32>
    %67 = math.log1p %66 : vector<32x256xf32>
    %cst_28 = arith.constant 0.00999999977 : f32
    %68 = vector.broadcast %cst_28 : f32 to vector<32x256xf32>
    %69 = arith.mulf %67, %68 : vector<32x256xf32>
    %cst_29 = arith.constant 2.000000e+01 : f32
    %70 = vector.broadcast %cst_29 : f32 to vector<32x256xf32>
    %71 = arith.cmpf ogt, %63, %70 : vector<32x256xf32>
    %72 = arith.select %71, %61, %69 : vector<32x256xi1>, vector<32x256xf32>
    %73 = arith.truncf %72 : vector<32x256xf32> to vector<32x256xbf16>
    %c2_30 = arith.constant 2 : index
    %c0_31 = arith.constant 0 : index
    %c0_32 = arith.constant 0 : index
    %74 = vector.load %arg2[%c2_30, %c0_31, %c0_32] : memref<5x32x32xbf16, #tpu.memory_space<vmem>>, vector<1x32x32xbf16>
    %75 = vector.shape_cast %74 : vector<1x32x32xbf16> to vector<32x32xbf16>
    %cst_33 = arith.constant dense<0.000000e+00> : vector<32x256xf32>
    %76 = tpu.matmul %75, %73, %cst_33 {dimension_numbers = #tpu.dot_dimension_numbers<[1], [0], [0], [1], [0, 0, 1, 1], [], []>} : vector<32x32xbf16>, vector<32x256xbf16>, vector<32x256xf32> -> vector<32x256xf32>
    %c3 = arith.constant 3 : index
    %c0_34 = arith.constant 0 : index
    %c0_35 = arith.constant 0 : index
    %77 = vector.load %arg5[%c3, %c0_34, %c0_35] : memref<6x32x1xf32, #tpu.memory_space<vmem>>, vector<1x32x1xf32>
    %78 = vector.shape_cast %77 : vector<1x32x1xf32> to vector<32x1xf32>
    %79 = vector.broadcast %78 : vector<32x1xf32> to vector<32x256xf32>
    %80 = arith.addf %76, %79 : vector<32x256xf32>
    %cst_36 = arith.constant 1.000000e+02 : f32
    %81 = vector.broadcast %cst_36 : f32 to vector<32x256xf32>
    %82 = arith.mulf %81, %80 : vector<32x256xf32>
    %cst_37 = arith.constant 2.000000e+01 : f32
    %83 = vector.broadcast %cst_37 : f32 to vector<32x256xf32>
    %84 = arith.minimumf %82, %83 : vector<32x256xf32>
    %85 = math.exp %84 : vector<32x256xf32>
    %86 = math.log1p %85 : vector<32x256xf32>
    %cst_38 = arith.constant 0.00999999977 : f32
    %87 = vector.broadcast %cst_38 : f32 to vector<32x256xf32>
    %88 = arith.mulf %86, %87 : vector<32x256xf32>
    %cst_39 = arith.constant 2.000000e+01 : f32
    %89 = vector.broadcast %cst_39 : f32 to vector<32x256xf32>
    %90 = arith.cmpf ogt, %82, %89 : vector<32x256xf32>
    %91 = arith.select %90, %80, %88 : vector<32x256xi1>, vector<32x256xf32>
    %92 = arith.truncf %91 : vector<32x256xf32> to vector<32x256xbf16>
    %c1_40 = arith.constant 1 : index
    %c0_41 = arith.constant 0 : index
    %c0_42 = arith.constant 0 : index
    %93 = vector.load %arg4[%c1_40, %c0_41, %c0_42] : memref<2x32x32xf32, #tpu.memory_space<vmem>>, vector<1x32x32xf32>
    %94 = vector.shape_cast %93 : vector<1x32x32xf32> to vector<32x32xf32>
    %c3_43 = arith.constant 3 : index
    %c0_44 = arith.constant 0 : index
    %c0_45 = arith.constant 0 : index
    %95 = vector.load %arg2[%c3_43, %c0_44, %c0_45] : memref<5x32x32xbf16, #tpu.memory_space<vmem>>, vector<1x32x32xbf16>
    %96 = vector.shape_cast %95 : vector<1x32x32xbf16> to vector<32x32xbf16>
    %cst_46 = arith.constant dense<0.000000e+00> : vector<32x256xf32>
    %97 = tpu.matmul %96, %92, %cst_46 {dimension_numbers = #tpu.dot_dimension_numbers<[1], [0], [0], [1], [0, 0, 1, 1], [], []>} : vector<32x32xbf16>, vector<32x256xbf16>, vector<32x256xf32> -> vector<32x256xf32>
    %98 = vector.extract_strided_slice %94 {offsets = [0, 0], sizes = [32, 1], strides = [1, 1]} : vector<32x32xf32> to vector<32x1xf32>
    %99 = vector.extract_strided_slice %0 {offsets = [0, 0], sizes = [1, 256], strides = [1, 1]} : vector<3x256xf32> to vector<1x256xf32>
    %100 = vector.broadcast %98 : vector<32x1xf32> to vector<32x256xf32>
    %101 = vector.broadcast %99 : vector<1x256xf32> to vector<32x256xf32>
    %102 = arith.mulf %100, %101 : vector<32x256xf32>
    %103 = arith.addf %97, %102 : vector<32x256xf32>
    %104 = vector.extract_strided_slice %94 {offsets = [0, 1], sizes = [32, 1], strides = [1, 1]} : vector<32x32xf32> to vector<32x1xf32>
    %105 = vector.extract_strided_slice %0 {offsets = [1, 0], sizes = [1, 256], strides = [1, 1]} : vector<3x256xf32> to vector<1x256xf32>
    %106 = vector.broadcast %104 : vector<32x1xf32> to vector<32x256xf32>
    %107 = vector.broadcast %105 : vector<1x256xf32> to vector<32x256xf32>
    %108 = arith.mulf %106, %107 : vector<32x256xf32>
    %109 = arith.addf %103, %108 : vector<32x256xf32>
    %110 = vector.extract_strided_slice %94 {offsets = [0, 2], sizes = [32, 1], strides = [1, 1]} : vector<32x32xf32> to vector<32x1xf32>
    %111 = vector.extract_strided_slice %0 {offsets = [2, 0], sizes = [1, 256], strides = [1, 1]} : vector<3x256xf32> to vector<1x256xf32>
    %112 = vector.broadcast %110 : vector<32x1xf32> to vector<32x256xf32>
    %113 = vector.broadcast %111 : vector<1x256xf32> to vector<32x256xf32>
    %114 = arith.mulf %112, %113 : vector<32x256xf32>
    %115 = arith.addf %109, %114 : vector<32x256xf32>
    %c4 = arith.constant 4 : index
    %c0_47 = arith.constant 0 : index
    %c0_48 = arith.constant 0 : index
    %116 = vector.load %arg5[%c4, %c0_47, %c0_48] : memref<6x32x1xf32, #tpu.memory_space<vmem>>, vector<1x32x1xf32>
    %117 = vector.shape_cast %116 : vector<1x32x1xf32> to vector<32x1xf32>
    %118 = vector.broadcast %117 : vector<32x1xf32> to vector<32x256xf32>
    %119 = arith.addf %115, %118 : vector<32x256xf32>
    %cst_49 = arith.constant 1.000000e+02 : f32
    %120 = vector.broadcast %cst_49 : f32 to vector<32x256xf32>
    %121 = arith.mulf %120, %119 : vector<32x256xf32>
    %cst_50 = arith.constant 2.000000e+01 : f32
    %122 = vector.broadcast %cst_50 : f32 to vector<32x256xf32>
    %123 = arith.minimumf %121, %122 : vector<32x256xf32>
    %124 = math.exp %123 : vector<32x256xf32>
    %125 = math.log1p %124 : vector<32x256xf32>
    %cst_51 = arith.constant 0.00999999977 : f32
    %126 = vector.broadcast %cst_51 : f32 to vector<32x256xf32>
    %127 = arith.mulf %125, %126 : vector<32x256xf32>
    %cst_52 = arith.constant 2.000000e+01 : f32
    %128 = vector.broadcast %cst_52 : f32 to vector<32x256xf32>
    %129 = arith.cmpf ogt, %121, %128 : vector<32x256xf32>
    %130 = arith.select %129, %119, %127 : vector<32x256xi1>, vector<32x256xf32>
    %131 = arith.truncf %130 : vector<32x256xf32> to vector<32x256xbf16>
    %c4_53 = arith.constant 4 : index
    %c0_54 = arith.constant 0 : index
    %c0_55 = arith.constant 0 : index
    %132 = vector.load %arg2[%c4_53, %c0_54, %c0_55] : memref<5x32x32xbf16, #tpu.memory_space<vmem>>, vector<1x32x32xbf16>
    %133 = vector.shape_cast %132 : vector<1x32x32xbf16> to vector<32x32xbf16>
    %cst_56 = arith.constant dense<0.000000e+00> : vector<32x256xf32>
    %134 = tpu.matmul %133, %131, %cst_56 {dimension_numbers = #tpu.dot_dimension_numbers<[1], [0], [0], [1], [0, 0, 1, 1], [], []>} : vector<32x32xbf16>, vector<32x256xbf16>, vector<32x256xf32> -> vector<32x256xf32>
    %c5 = arith.constant 5 : index
    %c0_57 = arith.constant 0 : index
    %c0_58 = arith.constant 0 : index
    %135 = vector.load %arg5[%c5, %c0_57, %c0_58] : memref<6x32x1xf32, #tpu.memory_space<vmem>>, vector<1x32x1xf32>
    %136 = vector.shape_cast %135 : vector<1x32x1xf32> to vector<32x1xf32>
    %137 = vector.broadcast %136 : vector<32x1xf32> to vector<32x256xf32>
    %138 = arith.addf %134, %137 : vector<32x256xf32>
    %cst_59 = arith.constant 1.000000e+02 : f32
    %139 = vector.broadcast %cst_59 : f32 to vector<32x256xf32>
    %140 = arith.mulf %139, %138 : vector<32x256xf32>
    %cst_60 = arith.constant 2.000000e+01 : f32
    %141 = vector.broadcast %cst_60 : f32 to vector<32x256xf32>
    %142 = arith.minimumf %140, %141 : vector<32x256xf32>
    %143 = math.exp %142 : vector<32x256xf32>
    %144 = math.log1p %143 : vector<32x256xf32>
    %cst_61 = arith.constant 0.00999999977 : f32
    %145 = vector.broadcast %cst_61 : f32 to vector<32x256xf32>
    %146 = arith.mulf %144, %145 : vector<32x256xf32>
    %cst_62 = arith.constant 2.000000e+01 : f32
    %147 = vector.broadcast %cst_62 : f32 to vector<32x256xf32>
    %148 = arith.cmpf ogt, %140, %147 : vector<32x256xf32>
    %149 = arith.select %148, %138, %146 : vector<32x256xi1>, vector<32x256xf32>
    %150 = arith.truncf %149 : vector<32x256xf32> to vector<32x256xbf16>
    %c0_63 = arith.constant 0 : index
    %c0_64 = arith.constant 0 : index
    %151 = vector.load %arg3[%c0_63, %c0_64] : memref<24x32xbf16, #tpu.memory_space<vmem>>, vector<24x32xbf16>
    %cst_65 = arith.constant dense<0.000000e+00> : vector<24x256xf32>
    %152 = tpu.matmul %151, %150, %cst_65 {dimension_numbers = #tpu.dot_dimension_numbers<[1], [0], [0], [1], [0, 0, 1, 1], [], []>} : vector<24x32xbf16>, vector<32x256xbf16>, vector<24x256xf32> -> vector<24x256xf32>
    %c0_66 = arith.constant 0 : index
    %c0_67 = arith.constant 0 : index
    %153 = vector.load %arg6[%c0_66, %c0_67] : memref<24x1xf32, #tpu.memory_space<vmem>>, vector<24x1xf32>
    %154 = vector.broadcast %153 : vector<24x1xf32> to vector<24x256xf32>
    %155 = arith.addf %152, %154 : vector<24x256xf32>
    %156 = vector.extract_strided_slice %155 {offsets = [0, 0], sizes = [17, 256], strides = [1, 1]} : vector<24x256xf32> to vector<17x256xf32>
    %c0_68 = arith.constant 0 : index
    %c0_69 = arith.constant 0 : index
    %157 = vector.load %arg7[%c0_68, %c0_69] : memref<17x256xf32, #tpu.memory_space<vmem>>, vector<17x256xf32>
    tpu.vector_store %arg7[%c0_68, %c0_69], %156 {strides = array<i32>} : memref<17x256xf32, #tpu.memory_space<vmem>>, vector<17x256xf32>,
    return
  }
  func.func @transform_0(%arg0: i32) -> (i32, i32) {
    %c0_i32 = arith.constant 0 : i32
    %c0_i32_0 = arith.constant 0 : i32
    return %c0_i32, %arg0 : i32, i32
  }
  func.func @transform_1(%arg0: i32) -> (i32, i32, i32) {
    %c0_i32 = arith.constant 0 : i32
    %c0_i32_0 = arith.constant 0 : i32
    %c0_i32_1 = arith.constant 0 : i32
    %c0_i32_2 = arith.constant 0 : i32
    return %c0_i32, %c0_i32_0, %c0_i32_1 : i32, i32, i32
  }
  func.func @transform_2(%arg0: i32) -> (i32, i32) {
    %c0_i32 = arith.constant 0 : i32
    %c0_i32_0 = arith.constant 0 : i32
    %c0_i32_1 = arith.constant 0 : i32
    return %c0_i32, %c0_i32_0 : i32, i32
  }
  func.func @transform_3(%arg0: i32) -> (i32, i32, i32) {
    %c0_i32 = arith.constant 0 : i32
    %c0_i32_0 = arith.constant 0 : i32
    %c0_i32_1 = arith.constant 0 : i32
    %c0_i32_2 = arith.constant 0 : i32
    return %c0_i32, %c0_i32_0, %c0_i32_1 : i32, i32, i32
  }
  func.func @transform_4(%arg0: i32) -> (i32, i32, i32) {
    %c0_i32 = arith.constant 0 : i32
    %c0_i32_0 = arith.constant 0 : i32
    %c0_i32_1 = arith.constant 0 : i32
    %c0_i32_2 = arith.constant 0 : i32
    return %c0_i32, %c0_i32_0, %c0_i32_1 : i32, i32, i32
  }
  func.func @transform_5(%arg0: i32) -> (i32, i32) {
    %c0_i32 = arith.constant 0 : i32
    %c0_i32_0 = arith.constant 0 : i32
    %c0_i32_1 = arith.constant 0 : i32
    return %c0_i32, %c0_i32_0 : i32, i32
  }
  func.func @transform_6(%arg0: i32) -> (i32, i32) {
    %c0_i32 = arith.constant 0 : i32
    %c0_i32_0 = arith.constant 0 : i32
    return %c0_i32, %arg0 : i32, i32
  }
}

</mosaic_0001>

<bundles_post_ra>
// kernel: sdf_network_forward.1
= control target key start
LH: loop header
LB: loop body
LE: loop exit
PB: predicated region body
PF: predicated region fallthrough
CT: control target
= control target key end

     0   :  { %11 = vsyncpa [#allocation3], 0  ;;  %s3586_s0 = inlined_call_operand.vmem [shape: f32[3,1000], index: 0, kind: input, shape index: {}]   ;;  %s3587_s1 = inlined_call_operand.vmem [shape: bf16[5,32,32], index: 1, kind: input, shape index: {}]   ;;  %s3588_s2 = inlined_call_operand.vmem [shape: bf16[24,32], index: 2, kind: input, shape index: {}]   ;;  %s3589_s3 = inlined_call_operand.vmem [shape: f32[2,32,32], index: 3, kind: input, shape index: {}]   ;;  %s3590_s4 = inlined_call_operand.vmem [shape: f32[6,32,1], index: 4, kind: input, shape index: {}]   ;;  %s3591_s5 = inlined_call_operand.vmem [shape: f32[24,1], index: 5, kind: input, shape index: {}]   ;;  %s3592_s6 = inlined_call_operand.hbm [shape: f32[17,1000], index: 6, kind: output, shape index: {}]  }
   0x1   :  { %13 = vsyncpa [#allocation3 + $0x1], 0  ;;  %s2447_s21 = smov 0   ;;  %s2449_s22 = smov 0  }
   0x2   :  { %s2451_s23 = smov 0   ;;  %s2453_s24 = smov 0  }
   0x3 LB: > { %s2468_s25 = sadd.s32 4294967295, %s2403_s24   ;;  %s1998_s26 = sadd.s32 4294967294, %s2403_s24   ;;  %s2403_s24 = sphi %s2453_s24, %s3668_s24   ;;  %s2399_s23 = sphi %s2451_s23, %s3667_s23   ;;  %s2395_s22 = sphi %s2449_s22, %s3666_s22   ;;  %s2391_s21 = sphi %s2447_s21, %s3665_s21  }
   0x4   : > { %s2472_s27 = sadd.s32 1, %s2403_s24   ;;  %s157_s28 = sadd.s32 1, %s2399_s23 }
   0x5   : > { %s154_s29 = ssub.s32 %s2403_s24, %s2472_s27  ;;  %p167_p0 = scmp.ne.s32.totalorder %s2399_s23, %s2395_s22 }
   0x6   : > { %p155_p1 = scmp.eq.s32.totalorder %s154_s29, 0  ;;  %p168_p2 = scmp.eq.s32.totalorder %s2468_s25, 3 }
   0x7   : > { %p173_p3 = scmp.ne.s32.totalorder %s2395_s22, %s2391_s21  ;;  %p174_p4 = scmp.eq.s32.totalorder %s1998_s26, 3 }
   0x8   : > { %s2483_s30 = scalar_select %p155_p1, %s2399_s23, %s157_s28  }
   0x9   : > { %p2485_p5 = por %p168_p2, %p167_p0  ;;  %p2489_p6 = por %p174_p4, %p173_p3 }
   0xa   : > { %p2001_p7 = scmp.ge.s32.totalorder %s2403_s24, 1  ;;  %p216_p8 = scmp.lt.s32.totalorder %s2403_s24, 5 }
   0xc   : > { %p217_p9 = pnand %p2001_p7, %p216_p8 }
   0xd   : > { %s2002_s10 = sshll.u32 (!%p217_p9), %s2468_s25, 1  ;;  %s243_s9 = sand.u32 (!%p217_p9), 1, %s2395_s22  }
   0xe   : > { %220 = sbr.rel (%p217_p9) target bundleno = 1770 (0x6ea), region = 44  ;;  %p247_p10 = scmp.lt.s32.totalorder (!%p217_p9), %s2002_s10, 7 }
   0xf   : > { %s2072_s13 = sshll.u32 (!%p217_p9), %s2468_s25, 8  ;;  %s3546_s25 = scalar_lea.sflag (!%p217_p9), [#allocation3], %s243_s9 }
  0x10   : > { %s3544_s16 = scalar_lea.hbm (!%p217_p9), %s3592_s6, %s2072_s13  ;;  %s2408_s18 = smov (!%p217_p9), [#allocation2]  }
  0x11   : > { %s2347_s19 = sshll.u32 (!%p217_p9), %s2408_s18, 4  ;;  %s2348_s19 = int_to_ptr.vmem [resolvable:$false] %s2347_s19 }
  0x12   : > { %s2349_s20 = scalar_lea.vmem (!%p217_p9), %s2348_s19, 1536 }
  0x13   : > { %v257_v0 = vld [vmem:[%s3589_s3 + $0x10] sm:$0xff]  ;;  %v2405_v1 = vmov 2   ;;  %v2406_v2 = vmov 1   ;;  %v258_v3 = vld [vmem:[%s3589_s3 + $0x18] sm:$0xff]  ;;  %v255_v4 = vld [vmem:[%s3589_s3] sm:$0xff]  ;;  %v2407_v5 = vmov 0   ;;  %v280_v26 = vlaneseq }
  0x14   : > { %2120 = vset.pattern.permute.xlu0 %v2405_v1  ;;  %2119 = vset.pattern.permute.xlu1 %v2406_v2  ;;  %v256_v6 = vld [vmem:[%s3589_s3 + $0x8] sm:$0xff]  ;;  %v409_v7 = vld [vmem:[%s3590_s4 + $0x18] sm:$0xff]  ;;  %v2006_v8 = vld [vmem:[%s3590_s4 + $0x30] sm:$0xff]  ;;  %s3670_s10 = smov (!%p247_p10, %s2002_s10), 7 }
  0x15   : > { %365 = vperm.xlu0 %2120, %v257_v0   ;;  %315 = vperm.xlu1 %2119, %v257_v0   ;;  %v2004_v9 = vld [vmem:[%s3590_s4 + $0x20] sm:$0xff]  ;;  %v2018_v10 = vld [vmem:[%s3590_s4 + $0x50] sm:$0xff]  ;;  %v407_v15 = vld [vmem:[%s3590_s4 + $0x8] sm:$0xff]  ;;  %s2003_s11 = sshll.u32 %s3670_s10, 2  ;;  %v281_v27 = vshrl.u32 %v280_v26, 7  ;;  %s2073_s10 = smul.u32 48, %s243_s9 }
  0x16   : > { %648 = vmatprep.mubr.bf16.mxu0 %v2407_v5  ;;  %879 = vmatprep.mubr.bf16.mxu1 %v2407_v5  ;;  %v408_v11 = vld [vmem:[%s3590_s4 + $0x10] sm:$0xff]  ;;  %v2016_v12 = vld [vmem:[%s3590_s4 + $0x40] sm:$0xff]  ;;  %v2007_v17 = vld [vmem:[%s3590_s4 + $0x38] sm:$0xff]  ;;  %s250_s14 = scalar_lea.vmem %s3586_s0, %s2003_s11 }
  0x17   : > { %v406_v13 = vld [vmem:[%s3590_s4] sm:$0xff]  ;;  %v2030_v14 = vld [vmem:[%s3590_s4 + $0x70] sm:$0xff]  ;;  %v2005_v19 = vld [vmem:[%s3590_s4 + $0x28] sm:$0xff]  ;;  %v324_v30 = vsub.s32 1, %v281_v27  ;;  %v328_v31 = vsub.s32 5, %v281_v27  ;;  %v282_v34 = vsub.s32 0, %v281_v27 }
  0x18   : > { %v2028_v16 = vld [vmem:[%s3590_s4 + $0x60] sm:$0xff]  ;;  %v2038_v18 = vld [vmem:[%s3589_s3 + $0x30] sm:$0xff]  ;;  %v2037_v20 = vld [vmem:[%s3589_s3 + $0x28] sm:$0xff]  ;;  %v286_v35 = vsub.s32 4, %v281_v27  ;;  %v374_v37 = vsub.s32 2, %v281_v27  ;;  %v378_v38 = vsub.s32 6, %v281_v27 }
  0x19   : > { %319 = vperm.xlu1 %2119, %v258_v3   ;;  %357 = vperm.xlu0 %2120, %v255_v4   ;;  %v2019_v21 = vld [vmem:[%s3590_s4 + $0x58] sm:$0xff]  ;;  %v2017_v22 = vld [vmem:[%s3590_s4 + $0x48] sm:$0xff]  ;;  %v254_v36 = vld [vmem:[%s250_s14] sm:$0x77]  ;;  %s245_s11 = scalar_lea.vmem [#allocation2], %s2073_s10 }
  0x1a   : > { %v2031_v23 = vld [vmem:[%s3590_s4 + $0x78] sm:$0xff]  ;;  %v2029_v24 = vld [vmem:[%s3590_s4 + $0x68] sm:$0xff]  ;;  %v325_v39 = vrot.slane %v254_v36, %v324_v30  ;;  %v329_v40 = vrot.slane %v254_v36, %v328_v31  ;;  %v283_v41 = vrot.slane %v254_v36, %v282_v34  ;;  %v287_v42 = vrot.slane %v254_v36, %v286_v35  ;;  %s1936_s12 = sshll.u32 %s245_s11, 4  ;;  %s3539_s12 = int_to_ptr.vmem [resolvable:$true] %s1936_s12 }
  0x1b   : > { %v2039_v25 = vld [vmem:[%s3589_s3 + $0x38] sm:$0xff]  ;;  %v375_v43 = vrot.slane %v254_v36, %v374_v37  ;;  %v379_v44 = vrot.slane %v254_v36, %v378_v38  ;;  %s2343_s17 = scalar_lea.vmem %s3539_s12, 768  ;;  %p2350_p0 = scmp.lt.s32.totalorder %s3539_s12, %s2348_s19 }
  0x1c   : > { %v2583_v47 = vrot.slane %v325_v39, %v324_v30  ;;  %v2585_v48 = vrot.slane %v329_v40, %v324_v30  ;;  %v2587_v49 = vrot.slane %v283_v41, %v282_v34  ;;  %v2589_v50 = vrot.slane %v287_v42, %v282_v34  ;;  %p2344_p11 = scmp.ne.s32.totalorder %s3539_s12, %s2343_s17  ;;  %p2351_p1 = scmp.lt.s32.totalorder %s2349_s20, %s2343_s17 }
  0x1d   : > { %2121 = vset.pattern.permute.xlu1 %v2405_v1  ;;  %2124 = vset.pattern.permute.xlu0 %v2407_v5  ;;  %v2591_v51 = vrot.slane %v375_v43, %v374_v37  ;;  %v2593_v52 = vrot.slane %v379_v44, %v374_v37 }
  0x1e   : > { %369 = vperm.xlu1 %2121, %v258_v3   ;;  %271 = vperm.xlu0 %2124, %v257_v0   ;;  %p2345_p12 = pnand %p2344_p11, %p2485_p5  ;;  %p2352_p2 = por %p2351_p1, %p2350_p0 }
  0x20   : > { %p2346_p13 = pneg %p2345_p12 }
  0x22   : > { %2122 = vset.pattern.permute.xlu1 %v2407_v5  ;;  %276 = vperm.xlu0 %2124, %v258_v3   ;;  %p2353_p3 = pnand %p2352_p2, %p2346_p13 }
  0x23   : > { %261 = vperm.xlu1 %2122, %v255_v4  }
  0x26   : > { %266 = vperm.xlu0 %2124, %v256_v6  }
  0x27   : > { %2123 = vset.pattern.permute.xlu1 %v2406_v2 }
  0x28   : > { %307 = vperm.xlu1 %2123, %v255_v4  }
  0x2a   : > { %427 = vperm.xlu0 %2124, %v409_v7  }
  0x2c   : > { %311 = vperm.xlu1 %2123, %v256_v6  }
  0x2e   : > { %591 = vperm.xlu0 %2124, %v2006_v8  }
  0x30   : > { %2125 = vset.pattern.permute.xlu1 %v2405_v1 }
  0x31   : > { %361 = vperm.xlu1 %2125, %v256_v6  }
  0x32   : > { %581 = vperm.xlu0 %2124, %v2004_v9  }
  0x35   : > { %2126 = vset.pattern.permute.xlu1 %v2407_v5 }
  0x36   : > { %823 = vperm.xlu0 %2124, %v2018_v10   ;;  %422 = vperm.xlu1 %2126, %v408_v11  }
  0x3a   : > { %813 = vperm.xlu0 %2124, %v2016_v12   ;;  %412 = vperm.xlu1 %2126, %v406_v13  }
  0x3e   : > { %1054 = vperm.xlu0 %2124, %v2030_v14   ;;  %417 = vperm.xlu1 %2126, %v407_v15  }
  0x42   : > { %1044 = vperm.xlu0 %2124, %v2028_v16   ;;  %596 = vperm.xlu1 %2126, %v2007_v17  }
  0x46   : > { %1285 = vperm.xlu0 %2124, %v2038_v18   ;;  %586 = vperm.xlu1 %2126, %v2005_v19  }
  0x4a   : > { %1280 = vperm.xlu0 %2124, %v2037_v20   ;;  %828 = vperm.xlu1 %2126, %v2019_v21  }
  0x4e   : > { %818 = vperm.xlu1 %2126, %v2017_v22   ;;  %2129 = vset.pattern.permute.xlu0 %v2406_v2 }
  0x4f   : > { %1379 = vperm.xlu0 %2129, %v2038_v18  }
  0x52   : > { %1059 = vperm.xlu1 %2126, %v2031_v23  }
  0x56   : > { %1049 = vperm.xlu1 %2126, %v2029_v24  }
  0x5a   : > { %1290 = vperm.xlu1 %2126, %v2039_v25  }
  0x5e   : > { %2127 = vset.pattern.permute.xlu1 %v2406_v2 }
  0x5f   : > { %1383 = vperm.xlu1 %2127, %v2039_v25  }
  0x63   : > { %2128 = vset.pattern.permute.xlu1 %v2407_v5 }
  0x90   : > { %v316_v28 = vpop.permute.xlu1 %315  ;;  %v366_v29 = vpop.permute.xlu0 %365 }
  0x91   : > { %v344_v14 = vmul.f32 %v2583_v47, %v316_v28  ;;  %v345_v15 = vmul.f32 %v2585_v48, %v316_v28  ;;  %v394_v18 = vmul.f32 %v2591_v51, %v366_v29  ;;  %v395_v19 = vmul.f32 %v2593_v52, %v366_v29 }
  0x94   : > { %v320_v32 = vpop.permute.xlu1 %319  ;;  %v2581_v33 = vpop.permute.xlu0 %357 }
  0x95   : > { %v346_v54 = vmul.f32 %v2583_v47, %v320_v32  ;;  %v347_v55 = vmul.f32 %v2585_v48, %v320_v32  ;;  %v390_v35 = vmul.f32 %v2591_v51, %v2581_v33  ;;  %v391_v36 = vmul.f32 %v2593_v52, %v2581_v33 }
  0x99   : > { %v370_v45 = vpop.permute.xlu1 %369  ;;  %v272_v46 = vpop.permute.xlu0 %271 }
  0x9a   : > { %v396_v62 = vmul.f32 %v2591_v51, %v370_v45  ;;  %v397_v63 = vmul.f32 %v2593_v52, %v370_v45  ;;  %v302_v9 = vmul.f32 %v2587_v49, %v272_v46  ;;  %v303_v10 = vmul.f32 %v2589_v50, %v272_v46 }
  0x9c   : > { %v352_v20 = vadd.f32 %v344_v14, %v302_v9  ;;  %v353_v21 = vadd.f32 %v345_v15, %v303_v10 }
  0x9d   : > { %v277_v53 = vpop.permute.xlu0 %276 }
  0x9e   : > { %v304_v56 = vmul.f32 %v2587_v49, %v277_v53  ;;  %v305_v57 = vmul.f32 %v2589_v50, %v277_v53  ;;  %v262_v58 = vpop.permute.xlu1 %261  ;;  %v402_v32 = vadd.f32 %v394_v18, %v352_v20  ;;  %v403_v34 = vadd.f32 %v395_v19, %v353_v21 }
  0x9f   : > { %v298_v27 = vmul.f32 %v2587_v49, %v262_v58  ;;  %v299_v28 = vmul.f32 %v2589_v50, %v262_v58 }
  0xa0   : > { %v354_v59 = vadd.f32 %v346_v54, %v304_v56  ;;  %v355_v60 = vadd.f32 %v347_v55, %v305_v57 }
  0xa1   : > { %v267_v61 = vpop.permute.xlu0 %266 }
  0xa2   : > { %v404_v3 = vadd.f32 %v396_v62, %v354_v59  ;;  %v405_v4 = vadd.f32 %v397_v63, %v355_v60  ;;  %v300_v39 = vmul.f32 %v2587_v49, %v267_v61  ;;  %v301_v40 = vmul.f32 %v2589_v50, %v267_v61 }
  0xa3   : > { %v308_v0 = vpop.permute.xlu1 %307 }
  0xa4   : > { %v340_v22 = vmul.f32 %v2583_v47, %v308_v0  ;;  %v341_v23 = vmul.f32 %v2585_v48, %v308_v0 }
  0xa5   : > { %v428_v6 = vpop.permute.xlu0 %427 }
  0xa6   : > { %v2601_v7 = vadd.f32 %v428_v6, %v404_v3  ;;  %v2603_v8 = vadd.f32 %v428_v6, %v405_v4  ;;  %v348_v30 = vadd.f32 %v340_v22, %v298_v27  ;;  %v349_v31 = vadd.f32 %v341_v23, %v299_v28 }
  0xa7   : > { %v312_v11 = vpop.permute.xlu1 %311 }
  0xa8   : > { %v2608_v12 = vmul.f32 100.0, %v2601_v7  ;;  %v2611_v13 = vmul.f32 100.0, %v2603_v8  ;;  %v342_v41 = vmul.f32 %v2583_v47, %v312_v11  ;;  %v343_v42 = vmul.f32 %v2585_v48, %v312_v11 }
  0xa9   : > { %v398_v45 = vadd.f32 %v390_v35, %v348_v30  ;;  %v399_v33 = vadd.f32 %v391_v36, %v349_v31 }
  0xaa   : > { %v452_v16 = vmin.f32 %v2608_v12, 20.0  ;;  %v453_v17 = vmin.f32 %v2611_v13, 20.0  ;;  %v350_v59 = vadd.f32 %v342_v41, %v300_v39  ;;  %v351_v60 = vadd.f32 %v343_v42, %v301_v40 }
  0xab   : > { %vm557_vm1 = vcmp.gt.f32.partialorder %v2611_v13, 20.0  ;;  %vm556_vm4 = vcmp.gt.f32.partialorder %v2608_v12, 20.0 }
  0xac   : > { %v466_v24 = vmul.f32 1.442695, %v452_v16  ;;  %v468_v25 = vmul.f32 1.442695, %v453_v17  ;;  %v362_v26 = vpop.permute.xlu1 %361 }
  0xad   : > { %v392_v46 = vmul.f32 %v2591_v51, %v362_v26  ;;  %v393_v53 = vmul.f32 %v2593_v52, %v362_v26 }
  0xae   : > { %2148 = vpow2.f32 %v466_v24 }
  0xaf   : > { %2150 = vpow2.f32 %v468_v25  ;;  %v400_v4 = vadd.f32 %v392_v46, %v350_v59  ;;  %v401_v6 = vadd.f32 %v393_v53, %v351_v60 }
  0xb1   : > { %v423_v29 = vpop.permute.xlu1 %422 }
  0xb2   : > { %v2627_v37 = vadd.f32 %v423_v29, %v402_v32  ;;  %v2629_v38 = vadd.f32 %v423_v29, %v403_v34 }
  0xb4   : > { %v2636_v43 = vmul.f32 100.0, %v2627_v37  ;;  %v2639_v44 = vmul.f32 100.0, %v2629_v38 }
  0xb5   : > { %v413_v54 = vpop.permute.xlu1 %412 }
  0xb6   : > { %v450_v55 = vmin.f32 %v2636_v43, 20.0  ;;  %v451_v56 = vmin.f32 %v2639_v44, 20.0  ;;  %v2645_v57 = vadd.f32 %v413_v54, %v398_v45  ;;  %v2647_v58 = vadd.f32 %v413_v54, %v399_v33 }
  0xb7   : > { %vm555_vm3 = vcmp.gt.f32.partialorder %v2639_v44, 20.0  ;;  %vm554_vm6 = vcmp.gt.f32.partialorder %v2636_v43, 20.0 }
  0xb8   : > { %v462_v61 = vmul.f32 1.442695, %v450_v55  ;;  %v464_v62 = vmul.f32 1.442695, %v451_v56  ;;  %v2650_v63 = vmul.f32 100.0, %v2645_v57  ;;  %v2653_v0 = vmul.f32 100.0, %v2647_v58 }
  0xb9   : > { %v418_v3 = vpop.permute.xlu1 %417 }
  0xba   : > { %2152 = vpow2.f32 %v462_v61  ;;  %v446_v9 = vmin.f32 %v2650_v63, 20.0  ;;  %v447_v10 = vmin.f32 %v2653_v0, 20.0  ;;  %v2657_v14 = vadd.f32 %v418_v3, %v400_v4 }
  0xbb   : > { %v2149_v11 = vpop.eup %2148  ;;  %2154 = vpow2.f32 %v464_v62  ;;  %v2659_v15 = vadd.f32 %v418_v3, %v401_v6  ;;  %vm550_vm12 = vcmp.gt.f32.partialorder %v2650_v63, 20.0  ;;  %vm551_vm14 = vcmp.gt.f32.partialorder %v2653_v0, 20.0  ;;  %v2136_v63 = vld [vmem:[%s3587_s1] sm:$0xff]  }
  0xbc   : > { %v2151_v16 = vpop.eup %2150  ;;  %v454_v17 = vmul.f32 1.442695, %v446_v9  ;;  %v456_v18 = vmul.f32 1.442695, %v447_v10  ;;  %v2662_v19 = vmul.f32 100.0, %v2657_v14  ;;  %v524_v22 = vadd.f32 1.0, %v2149_v11 }
  0xbd   : > { %v2665_v20 = vmul.f32 100.0, %v2659_v15  ;;  %v533_v21 = vadd.f32 1.0, %v2151_v16  ;;  %v536_v34 = vmul.f32 -0.5, %v2151_v16  ;;  %v527_v35 = vmul.f32 -0.5, %v2149_v11  ;;  %v597_v0 = vpop.permute.xlu1 %596 }
  0xbe   : > { %2156 = vpow2.f32 %v454_v17  ;;  %v448_v23 = vmin.f32 %v2662_v19, 20.0  ;;  %v539_v41 = vand.u32 2147483647, %v2151_v16  ;;  %v530_v59 = vand.u32 2147483647, %v2149_v11 }
  0xbf   : > { %2158 = vpow2.f32 %v456_v18  ;;  %v449_v24 = vmin.f32 %v2665_v20, 20.0  ;;  %v537_v45 = vadd.f32 1.0, %v536_v34  ;;  %v528_v53 = vadd.f32 1.0, %v527_v35 }
  0xc0   : > { %v458_v25 = vmul.f32 1.442695, %v448_v23  ;;  %2160 = vlog2.f32 %v533_v21  ;;  %vm2677_vm0 = vcmp.lt.f32.partialorder %v539_v41, 0.0004427343  ;;  %vm2686_vm2 = vcmp.lt.f32.partialorder %v530_v59, 0.0004427343 }
  0xc1   : > { %v460_v26 = vmul.f32 1.442695, %v449_v24  ;;  %2162 = vlog2.f32 %v524_v22  ;;  %v538_v4 = vmul.f32 %v2151_v16, %v537_v45  ;;  %v529_v17 = vmul.f32 %v2149_v11, %v528_v53 }
  0xc2   : > { %2164 = vpow2.f32 %v458_v25  ;;  %vm552_vm13 = vcmp.gt.f32.partialorder %v2662_v19, 20.0  ;;  %vm553_vm15 = vcmp.gt.f32.partialorder %v2665_v20, 20.0 }
  0xc3   : > { %2166 = vpow2.f32 %v460_v26 }
  0xc7   : > { %v2153_v27 = vpop.eup %2152 }
  0xc8   : > { %v2155_v28 = vpop.eup %2154  ;;  %v506_v30 = vadd.f32 1.0, %v2153_v27  ;;  %v509_v46 = vmul.f32 -0.5, %v2153_v27  ;;  %v512_v6 = vand.u32 2147483647, %v2153_v27 }
  0xc9   : > { %v515_v31 = vadd.f32 1.0, %v2155_v28  ;;  %v518_v55 = vmul.f32 -0.5, %v2155_v28  ;;  %v521_v24 = vand.u32 2147483647, %v2155_v28 }
  0xca   : > { %2168 = vlog2.f32 %v506_v30  ;;  %v510_v10 = vadd.f32 1.0, %v509_v46  ;;  %vm2694_vm5 = vcmp.lt.f32.partialorder %v512_v6, 0.0004427343 }
  0xcb   : > { %v2157_v32 = vpop.eup %2156  ;;  %2170 = vlog2.f32 %v515_v31  ;;  %v519_v21 = vadd.f32 1.0, %v518_v55  ;;  %vm522_vm7 = vcmp.lt.f32.partialorder %v521_v24, 0.0004427343 }
  0xcc   : > { %v2669_v29 = vpop.eup %2158  ;;  %v470_v36 = vadd.f32 1.0, %v2157_v32  ;;  %v473_v9 = vmul.f32 -0.5, %v2157_v32  ;;  %v476_v30 = vand.u32 2147483647, %v2157_v32 }
  0xcd   : > { %v479_v39 = vadd.f32 1.0, %v2669_v29  ;;  %v2161_v40 = vpop.eup %2160  ;;  %v482_v18 = vmul.f32 -0.5, %v2669_v29  ;;  %v520_v41 = vmul.f32 %v2155_v28, %v519_v21  ;;  %v485_v53 = vand.u32 2147483647, %v2669_v29 }
  0xce   : > { %2172 = vlog2.f32 %v470_v36  ;;  %v2163_v42 = vpop.eup %2162  ;;  %v535_v56 = vmul.f32 0.6931472, %v2161_v40  ;;  %v474_v26 = vadd.f32 1.0, %v473_v9  ;;  %v511_v36 = vmul.f32 %v2153_v27, %v510_v10 }
  0xcf   : > { %2174 = vlog2.f32 %v479_v39  ;;  %v2672_v33 = vpop.eup %2164  ;;  %v526_v62 = vmul.f32 0.6931472, %v2163_v42  ;;  %v483_v39 = vadd.f32 1.0, %v482_v18  ;;  %vm2704_vm8 = vcmp.lt.f32.partialorder %v476_v30, 0.0004427343 }
  0xd0   : > { %v2674_v54 = vpop.eup %2166  ;;  %v488_v60 = vadd.f32 1.0, %v2672_v33  ;;  %v541_v22 = vsel %vm2677_vm0, %v538_v4, %v535_v56  ;;  %v491_v45 = vmul.f32 -0.5, %v2672_v33  ;;  %v475_v61 = vmul.f32 %v2157_v32, %v474_v26 }
  0xd1   : > { %v497_v3 = vadd.f32 1.0, %v2674_v54  ;;  %v532_v16 = vsel %vm2686_vm2, %v529_v17, %v526_v62  ;;  %v549_v34 = vmul.f32 0.01, %v541_v22  ;;  %v500_v55 = vmul.f32 -0.5, %v2674_v54 }
  0xd2   : > { %2176 = vlog2.f32 %v488_v60  ;;  %v548_v42 = vmul.f32 0.01, %v532_v16  ;;  %v484_v4 = vmul.f32 %v2669_v29, %v483_v39  ;;  %v492_v17 = vadd.f32 1.0, %v491_v45 }
  0xd3   : > { %2178 = vlog2.f32 %v497_v3  ;;  %v565_v3 = vsel %vm557_vm1, %v2603_v8, %v549_v34  ;;  %v501_v13 = vadd.f32 1.0, %v500_v55  ;;  %v494_v8 = vand.u32 2147483647, %v2672_v33 }
  0xd4   : > { %v564_v32 = vsel %vm556_vm4, %v2601_v7, %v548_v42  ;;  %vm486_vm9 = vcmp.lt.f32.partialorder %v485_v53, 0.0004427343  ;;  %v503_v22 = vand.u32 2147483647, %v2674_v54  ;;  %v493_v24 = vmul.f32 %v2672_v33, %v492_v17  ;;  %v587_v42 = vpop.permute.xlu1 %586 }
  0xd5   : > { %v502_v44 = vmul.f32 %v2674_v54, %v501_v13  ;;  %vm495_vm10 = vcmp.lt.f32.partialorder %v494_v8, 0.0004427343  ;;  %vm609_vm0 = vcmask 261120  }
  0xd6   : > { %vm504_vm11 = vcmp.lt.f32.partialorder %v503_v22, 0.0004427343 }
  0xd7   : > { %v2169_v11 = vpop.eup %2168 }
  0xd8   : > { %v2171_v31 = vpop.eup %2170  ;;  %v508_v35 = vmul.f32 0.6931472, %v2169_v11 }
  0xd9   : > { %v517_v40 = vmul.f32 0.6931472, %v2171_v31 }
  0xda   : > { %v514_v46 = vsel %vm2694_vm5, %v511_v36, %v508_v35 }
  0xdb   : > { %v2173_v56 = vpop.eup %2172  ;;  %v523_v59 = vsel %vm522_vm7, %v520_v41, %v517_v40  ;;  %v546_v60 = vmul.f32 0.01, %v514_v46 }
  0xdc   : > { %v2175_v28 = vpop.eup %2174  ;;  %v547_v62 = vmul.f32 0.01, %v523_v59  ;;  %v472_v6 = vmul.f32 0.6931472, %v2173_v56 }
  0xdd   : > { %v562_v9 = vsel %vm554_vm6, %v2627_v37, %v546_v60  ;;  %v481_v10 = vmul.f32 0.6931472, %v2175_v28 }
  0xde   : > { %v563_v18 = vsel %vm555_vm3, %v2629_v38, %v547_v62  ;;  %v568_v21 = vpack.c.bf16 %v564_v32, %v562_v9  ;;  %v478_v37 = vsel %vm2704_vm8, %v475_v61, %v472_v6 }
  0xdf   : > { %v569_v29 = vpack.c.bf16 %v565_v3, %v563_v18  ;;  %v2177_v43 = vpop.eup %2176  ;;  %v487_v12 = vsel %vm486_vm9, %v484_v4, %v481_v10  ;;  %v542_v16 = vmul.f32 0.01, %v478_v37 }
  0xe0   : > { %v2179_v7 = vpop.eup %2178  ;;  %v490_v23 = vmul.f32 0.6931472, %v2177_v43  ;;  %v543_v11 = vmul.f32 0.01, %v487_v12 }
  0xe1   : > { %628 = vmatprep.subr.bf16.mxu0 %v569_v29  ;;  %v499_v38 = vmul.f32 0.6931472, %v2179_v7  ;;  %v558_v33 = vsel %vm550_vm12, %v2645_v57, %v542_v16  ;;  %v2137_v57 = vld [vmem:[%s3587_s1 + $0x8] sm:$0xff]  }
  0xe2   : > { %629 = vmatpush1.bf16.msra.mxu0 %v568_v21  ;;  %v496_v25 = vsel %vm495_vm10, %v493_v24, %v490_v23  ;;  %v559_v34 = vsel %vm551_vm14, %v2647_v58, %v543_v11  ;;  %v592_v58 = vpop.permute.xlu0 %591 }
  0xe3   : > { %v505_v26 = vsel %vm504_vm11, %v502_v44, %v499_v38  ;;  %v544_v30 = vmul.f32 0.01, %v496_v25 }
  0xe4   : > { %v545_v31 = vmul.f32 0.01, %v505_v26 }
  0xe5   : > { %v560_v54 = vsel %vm552_vm13, %v2657_v14, %v544_v30 }
  0xe6   : > { %v561_v35 = vsel %vm553_vm15, %v2659_v15, %v545_v31  ;;  %v566_v36 = vpack.c.bf16 %v560_v54, %v558_v33  ;;  %v582_v14 = vpop.permute.xlu0 %581 }
  0xe7   : > { %v567_v39 = vpack.c.bf16 %v561_v35, %v559_v34 }
  0xe9   : > { %630 = vmatprep.subr.bf16.mxu0 %v567_v39 }
  0xea   : > { %631 = vmatpush1.bf16.msra.mxu0 %v566_v36 }
  0xed   : > { %2010 = vmatmul.mubr.msk.bf16.vlgmr.msra.gmra.mxu0 %vm609_vm0, %v2136_v63 }
  0xee   : > { %658 = vmatprep.mubr.bf16.mxu0 %v2407_v5 }
  0xf5   : > { %2011 = vmatmul.mubr.msk.bf16.gmra.mxu0 %vm609_vm0, %v2137_v57 }
  0xf6   : > { %1110 = vmatprep.mubr.bf16.mxu0 %v2407_v5 }
 0x1ad   : > { %v650_v15 = vpop.f32.mrf.mxu0 }
 0x1ae   : > { %v2745_v19 = vadd.f32 %v650_v15, %v582_v14 }
 0x1af   : > { %v652_v20 = vpop.f32.mrf.mxu0 }
 0x1b0   : > { %v2748_v40 = vmul.f32 100.0, %v2745_v19  ;;  %v2750_v41 = vadd.f32 %v652_v20, %v582_v14 }
 0x1b1   : > { %v654_v45 = vpop.f32.mrf.mxu0 }
 0x1b2   : > { %v2753_v46 = vmul.f32 100.0, %v2750_v41  ;;  %v2755_v53 = vadd.f32 %v654_v45, %v587_v42  ;;  %v677_v56 = vmin.f32 %v2748_v40, 20.0 }
 0x1b3   : > { %v656_v55 = vpop.f32.mrf.mxu0 }
 0x1b4   : > { %v678_v59 = vmin.f32 %v2753_v46, 20.0  ;;  %v2760_v60 = vmul.f32 100.0, %v2755_v53  ;;  %v2762_v61 = vadd.f32 %v656_v55, %v587_v42  ;;  %v685_v9 = vmul.f32 1.442695, %v677_v56 }
 0x1b5   : > { %v660_v27 = vpop.f32.mrf.mxu0  ;;  %vm782_vm14 = vcmp.gt.f32.partialorder %v2753_v46, 20.0 }
 0x1b6   : > { %v687_v28 = vmul.f32 1.442695, %v678_v59  ;;  %v679_v62 = vmin.f32 %v2760_v60, 20.0  ;;  %v2766_v3 = vmul.f32 100.0, %v2762_v61  ;;  %v2768_v4 = vadd.f32 %v660_v27, %v592_v58 }
 0x1b7   : > { %v662_v6 = vpop.f32.mrf.mxu0  ;;  %vm783_vm15 = vcmp.gt.f32.partialorder %v2760_v60, 20.0 }
 0x1b8   : > { %2180 = vpow2.f32 %v687_v28  ;;  %v689_v32 = vmul.f32 1.442695, %v679_v62  ;;  %v2770_v10 = vadd.f32 %v662_v6, %v592_v58  ;;  %v680_v17 = vmin.f32 %v2766_v3, 20.0 }
 0x1b9   : > { %v2774_v18 = vmul.f32 100.0, %v2768_v4  ;;  %v664_v21 = vpop.f32.mrf.mxu0  ;;  %vm784_vm4 = vcmp.gt.f32.partialorder %v2766_v3, 20.0  ;;  %v2138_v3 = vld [vmem:[%s3587_s1 + $0x10] sm:$0xff]  }
 0x1ba   : > { %2182 = vpow2.f32 %v689_v32  ;;  %v2777_v13 = vmul.f32 100.0, %v2770_v10  ;;  %v2779_v8 = vadd.f32 %v664_v21, %v597_v0  ;;  %v691_v29 = vmul.f32 1.442695, %v680_v17 }
 0x1bb   : > { %v681_v22 = vmin.f32 %v2774_v18, 20.0  ;;  %v666_v37 = vpop.f32.mrf.mxu0  ;;  %2184 = vpow2.f32 %v685_v9  ;;  %vm785_vm13 = vcmp.gt.f32.partialorder %v2774_v18, 20.0 }
 0x1bc   : > { %v682_v43 = vmin.f32 %v2777_v13, 20.0  ;;  %v2784_v12 = vmul.f32 100.0, %v2779_v8  ;;  %v2786_v7 = vadd.f32 %v666_v37, %v597_v0  ;;  %2186 = vpow2.f32 %v691_v29 }
 0x1bd   : > { %v693_v23 = vmul.f32 1.442695, %v681_v22  ;;  %vm786_vm11 = vcmp.gt.f32.partialorder %v2777_v13, 20.0 }
 0x1be   : > { %v695_v24 = vmul.f32 1.442695, %v682_v43  ;;  %v683_v38 = vmin.f32 %v2784_v12, 20.0  ;;  %v2790_v44 = vmul.f32 100.0, %v2786_v7  ;;  %vm787_vm10 = vcmp.gt.f32.partialorder %v2784_v12, 20.0 }
 0x1bf   : > { %2188 = vpow2.f32 %v693_v23 }
 0x1c0   : > { %2190 = vpow2.f32 %v695_v24  ;;  %v697_v16 = vmul.f32 1.442695, %v683_v38  ;;  %v684_v11 = vmin.f32 %v2790_v44, 20.0  ;;  %vm788_vm12 = vcmp.gt.f32.partialorder %v2790_v44, 20.0 }
 0x1c2   : > { %2192 = vpow2.f32 %v697_v16  ;;  %v699_v25 = vmul.f32 1.442695, %v684_v11 }
 0x1c4   : > { %2194 = vpow2.f32 %v699_v25 }
 0x1c5   : > { %v2181_v26 = vpop.eup %2180 }
 0x1c6   : > { %v710_v31 = vadd.f32 1.0, %v2181_v26  ;;  %v713_v45 = vmul.f32 -0.5, %v2181_v26  ;;  %v716_v55 = vand.u32 2147483647, %v2181_v26 }
 0x1c7   : > { %v2793_v30 = vpop.eup %2182 }
 0x1c8   : > { %v2795_v33 = vpop.eup %2184  ;;  %v719_v34 = vadd.f32 1.0, %v2793_v30  ;;  %2196 = vlog2.f32 %v710_v31  ;;  %v722_v62 = vmul.f32 -0.5, %v2793_v30  ;;  %v725_v6 = vand.u32 2147483647, %v2793_v30 }
 0x1c9   : > { %v2797_v54 = vpop.eup %2186  ;;  %v701_v57 = vadd.f32 1.0, %v2795_v33  ;;  %v704_v42 = vmul.f32 -0.5, %v2795_v33  ;;  %v714_v32 = vadd.f32 1.0, %v713_v45  ;;  %vm2813_vm1 = vcmp.lt.f32.partialorder %v716_v55, 0.0004427343 }
 0x1ca   : > { %v728_v35 = vadd.f32 1.0, %v2797_v54  ;;  %v731_v56 = vmul.f32 -0.5, %v2797_v54  ;;  %v707_v37 = vand.u32 2147483647, %v2795_v33  ;;  %v734_v38 = vand.u32 2147483647, %v2797_v54 }
 0x1cb   : > { %v705_v27 = vadd.f32 1.0, %v704_v42  ;;  %vm2823_vm2 = vcmp.lt.f32.partialorder %v725_v6, 0.0004427343 }
 0x1cc   : > { %v2189_v36 = vpop.eup %2188  ;;  %2198 = vlog2.f32 %v728_v35  ;;  %v732_v22 = vadd.f32 1.0, %v731_v56  ;;  %vm2839_vm6 = vcmp.lt.f32.partialorder %v734_v38, 0.0004427343  ;;  %vm2862_vm9 = vcmp.lt.f32.partialorder %v707_v37, 0.0004427343 }
 0x1cd   : > { %v2191_v39 = vpop.eup %2190  ;;  %v737_v63 = vadd.f32 1.0, %v2189_v36  ;;  %2200 = vlog2.f32 %v719_v34  ;;  %v740_v28 = vmul.f32 -0.5, %v2189_v36  ;;  %v743_v9 = vand.u32 2147483647, %v2189_v36 }
 0x1ce   : > { %v746_v58 = vadd.f32 1.0, %v2191_v39  ;;  %v749_v59 = vmul.f32 -0.5, %v2191_v39  ;;  %v2821_v16 = vmul.f32 %v2795_v33, %v705_v27  ;;  %v752_v25 = vand.u32 2147483647, %v2191_v39 }
 0x1cf   : > { %v2802_v0 = vpop.eup %2192  ;;  %2202 = vlog2.f32 %v737_v63  ;;  %v741_v31 = vadd.f32 1.0, %v740_v28  ;;  %v723_v34 = vadd.f32 1.0, %v722_v62  ;;  %vm2827_vm3 = vcmp.lt.f32.partialorder %v743_v9, 0.0004427343 }
 0x1d0   : > { %2204 = vlog2.f32 %v746_v58  ;;  %v755_v14 = vadd.f32 1.0, %v2802_v0  ;;  %v758_v21 = vmul.f32 -0.5, %v2802_v0  ;;  %v750_v23 = vadd.f32 1.0, %v749_v59 }
 0x1d1   : > { %v2805_v15 = vpop.eup %2194  ;;  %2206 = vlog2.f32 %v701_v57  ;;  %v761_v58 = vand.u32 2147483647, %v2802_v0  ;;  %v733_v56 = vmul.f32 %v2797_v54, %v732_v22  ;;  %vm2835_vm5 = vcmp.lt.f32.partialorder %v752_v25, 0.0004427343 }
 0x1d2   : > { %v764_v20 = vadd.f32 1.0, %v2805_v15  ;;  %2208 = vlog2.f32 %v755_v14  ;;  %v767_v24 = vmul.f32 -0.5, %v2805_v15  ;;  %v715_v14 = vmul.f32 %v2181_v26, %v714_v32 }
 0x1d3   : > { %v770_v33 = vand.u32 2147483647, %v2805_v15  ;;  %v759_v55 = vadd.f32 1.0, %v758_v21  ;;  %v751_v28 = vmul.f32 %v2191_v39, %v750_v23  ;;  %v742_v26 = vmul.f32 %v2189_v36, %v741_v31 }
 0x1d4   : > { %2210 = vlog2.f32 %v764_v20  ;;  %v768_v62 = vadd.f32 1.0, %v767_v24  ;;  %vm2845_vm7 = vcmp.lt.f32.partialorder %v761_v58, 0.0004427343 }
 0x1d5   : > { %v2197_v17 = vpop.eup %2196  ;;  %v760_v38 = vmul.f32 %v2802_v0, %v759_v55  ;;  %vm771_vm8 = vcmp.lt.f32.partialorder %v770_v33, 0.0004427343 }
 0x1d6   : > { %v712_v6 = vmul.f32 0.6931472, %v2197_v17  ;;  %v724_v17 = vmul.f32 %v2793_v30, %v723_v34  ;;  %v769_v31 = vmul.f32 %v2805_v15, %v768_v62 }
 0x1d9   : > { %v2199_v43 = vpop.eup %2198 }
 0x1da   : > { %v2201_v11 = vpop.eup %2200  ;;  %v730_v20 = vmul.f32 0.6931472, %v2199_v43 }
 0x1db   : > { %v721_v43 = vmul.f32 0.6931472, %v2201_v11 }
 0x1dc   : > { %v2203_v63 = vpop.eup %2202  ;;  %v736_v39 = vsel %vm2839_vm6, %v733_v56, %v730_v20 }
 0x1dd   : > { %v2205_v42 = vpop.eup %2204  ;;  %v739_v45 = vmul.f32 0.6931472, %v2203_v63  ;;  %v718_v63 = vsel %vm2813_vm1, %v715_v14, %v712_v6  ;;  %v776_v30 = vmul.f32 0.01, %v736_v39  ;;  %v727_v34 = vsel %vm2823_vm2, %v724_v17, %v721_v43 }
 0x1de   : > { %v2207_v59 = vpop.eup %2206  ;;  %v748_v27 = vmul.f32 0.6931472, %v2205_v42  ;;  %v774_v29 = vmul.f32 0.01, %v718_v63  ;;  %v775_v33 = vmul.f32 0.01, %v727_v34 }
 0x1df   : > { %v2209_v21 = vpop.eup %2208  ;;  %v745_v36 = vsel %vm2827_vm3, %v742_v26, %v739_v45  ;;  %v703_v11 = vmul.f32 0.6931472, %v2207_v59  ;;  %v792_v12 = vsel %vm784_vm4, %v2762_v61, %v776_v30  ;;  %vm781_vm1 = vcmp.gt.f32.partialorder %v2748_v40, 20.0  ;;  %v824_v40 = vpop.permute.xlu0 %823 }
 0x1e0   : > { %v754_v54 = vsel %vm2835_vm5, %v751_v28, %v748_v27  ;;  %v757_v24 = vmul.f32 0.6931472, %v2209_v21  ;;  %v777_v42 = vmul.f32 0.01, %v745_v36  ;;  %v790_v44 = vsel %vm782_vm14, %v2750_v41, %v774_v29  ;;  %v2139_v41 = vld [vmem:[%s3587_s1 + $0x18] sm:$0xff]  }
 0x1e1   : > { %v2211_v23 = vpop.eup %2210  ;;  %v778_v58 = vmul.f32 0.01, %v754_v54  ;;  %v709_v14 = vsel %vm2862_vm9, %v2821_v16, %v703_v11  ;;  %v798_v18 = vpack.c.bf16 %v792_v12, %v790_v44 }
 0x1e2   : > { %v766_v25 = vmul.f32 0.6931472, %v2211_v23  ;;  %v763_v20 = vsel %vm2845_vm7, %v760_v38, %v757_v24  ;;  %v793_v13 = vsel %vm785_vm13, %v2768_v4, %v777_v42  ;;  %v773_v56 = vmul.f32 0.01, %v709_v14 }
 0x1e3   : > { %v779_v45 = vmul.f32 0.01, %v763_v20  ;;  %v794_v37 = vsel %vm786_vm11, %v2770_v10, %v778_v58  ;;  %v791_v10 = vsel %vm783_vm15, %v2755_v53, %v775_v33  ;;  %v814_v53 = vpop.permute.xlu0 %813 }
 0x1e4   : > { %v772_v57 = vsel %vm771_vm8, %v769_v31, %v766_v25  ;;  %v789_v61 = vsel %vm781_vm1, %v2745_v19, %v773_v56  ;;  %v829_v19 = vpop.permute.xlu1 %828 }
 0x1e5   : > { %v780_v15 = vmul.f32 0.01, %v772_v57  ;;  %v795_v35 = vsel %vm787_vm10, %v2779_v8, %v779_v45  ;;  %v797_v46 = vpack.c.bf16 %v791_v10, %v789_v61 }
 0x1e6   : > { %v799_v8 = vpack.c.bf16 %v795_v35, %v793_v13 }
 0x1e7   : > { %v796_v55 = vsel %vm788_vm12, %v2786_v7, %v780_v15 }
 0x1e8   : > { %v800_v16 = vpack.c.bf16 %v796_v55, %v794_v37  ;;  %v819_v28 = vpop.permute.xlu1 %818 }
 0x1ea   : > { %859 = vmatprep.subr.bf16.mxu1 %v800_v16 }
 0x1eb   : > { %860 = vmatpush1.bf16.msra.mxu1 %v799_v8 }
 0x1ec   : > { %861 = vmatprep.subr.bf16.mxu1 %v798_v18 }
 0x1ef   : > { %862 = vmatpush1.bf16.msra.mxu1 %v797_v46 }
 0x1f2   : > { %2022 = vmatmul.mubr.msk.bf16.vlgmr.msra.gmra.mxu1 %vm609_vm0, %v2138_v3 }
 0x1f3   : > { %889 = vmatprep.mubr.bf16.mxu1 %v2407_v5 }
 0x1fa   : > { %2023 = vmatmul.mubr.msk.bf16.gmra.mxu1 %vm609_vm0, %v2139_v41 }
 0x1fb   : > { %1349 = vmatprep.mubr.bf16.mxu1 %v2407_v5 }
 0x2b2   : > { %v881_v60 = vpop.f32.mrf.mxu1 }
 0x2b3   : > { %v2896_v4 = vadd.f32 %v881_v60, %v814_v53 }
 0x2b4   : > { %v883_v7 = vpop.f32.mrf.mxu1 }
 0x2b5   : > { %v2899_v59 = vmul.f32 100.0, %v2896_v4  ;;  %v2901_v27 = vadd.f32 %v883_v7, %v814_v53 }
 0x2b6   : > { %v885_v62 = vpop.f32.mrf.mxu1 }
 0x2b7   : > { %v2904_v6 = vmul.f32 100.0, %v2901_v27  ;;  %v2906_v9 = vadd.f32 %v885_v62, %v819_v28  ;;  %v908_v32 = vmin.f32 %v2899_v59, 20.0 }
 0x2b8   : > { %v887_v26 = vpop.f32.mrf.mxu1 }
 0x2b9   : > { %v909_v43 = vmin.f32 %v2904_v6, 20.0  ;;  %v2911_v21 = vmul.f32 100.0, %v2906_v9  ;;  %v2913_v54 = vadd.f32 %v887_v26, %v819_v28  ;;  %v916_v38 = vmul.f32 1.442695, %v908_v32 }
 0x2ba   : > { %v891_v22 = vpop.f32.mrf.mxu1  ;;  %vm1013_vm15 = vcmp.gt.f32.partialorder %v2904_v6, 20.0  ;;  %v2140_v6 = vld [vmem:[%s3587_s1 + $0x20] sm:$0xff]  }
 0x2bb   : > { %v918_v39 = vmul.f32 1.442695, %v909_v43  ;;  %v910_v17 = vmin.f32 %v2911_v21, 20.0  ;;  %v2917_v23 = vmul.f32 100.0, %v2913_v54  ;;  %v2919_v36 = vadd.f32 %v891_v22, %v824_v40 }
 0x2bc   : > { %v893_v24 = vpop.f32.mrf.mxu1  ;;  %vm1014_vm1 = vcmp.gt.f32.partialorder %v2911_v21, 20.0  ;;  %v2048_v21 = vld [vmem:[%s3590_s4 + $0x80] sm:$0xff] }
 0x2bd   : > { %2212 = vpow2.f32 %v918_v39  ;;  %v920_v11 = vmul.f32 1.442695, %v910_v17  ;;  %v2921_v25 = vadd.f32 %v893_v24, %v824_v40  ;;  %v911_v31 = vmin.f32 %v2917_v23, 20.0 }
 0x2be   : > { %v2925_v63 = vmul.f32 100.0, %v2919_v36  ;;  %v895_v58 = vpop.f32.mrf.mxu1  ;;  %vm1015_vm10 = vcmp.gt.f32.partialorder %v2917_v23, 20.0 }
 0x2bf   : > { %2214 = vpow2.f32 %v920_v11  ;;  %v2928_v20 = vmul.f32 100.0, %v2921_v25  ;;  %v2930_v30 = vadd.f32 %v895_v58, %v829_v19  ;;  %v922_v34 = vmul.f32 1.442695, %v911_v31 }
 0x2c0   : > { %v912_v57 = vmin.f32 %v2925_v63, 20.0  ;;  %v897_v42 = vpop.f32.mrf.mxu1  ;;  %2216 = vpow2.f32 %v916_v38  ;;  %vm1016_vm14 = vcmp.gt.f32.partialorder %v2925_v63, 20.0 }
 0x2c1   : > { %v913_v45 = vmin.f32 %v2928_v20, 20.0  ;;  %v2935_v0 = vmul.f32 100.0, %v2930_v30  ;;  %v2937_v15 = vadd.f32 %v897_v42, %v829_v19  ;;  %2218 = vpow2.f32 %v922_v34 }
 0x2c2   : > { %v924_v29 = vmul.f32 1.442695, %v912_v57  ;;  %vm1017_vm12 = vcmp.gt.f32.partialorder %v2928_v20, 20.0 }
 0x2c3   : > { %v926_v14 = vmul.f32 1.442695, %v913_v45  ;;  %v914_v35 = vmin.f32 %v2935_v0, 20.0  ;;  %v2941_v33 = vmul.f32 100.0, %v2937_v15  ;;  %vm1018_vm11 = vcmp.gt.f32.partialorder %v2935_v0, 20.0 }
 0x2c4   : > { %2220 = vpow2.f32 %v924_v29 }
 0x2c5   : > { %2222 = vpow2.f32 %v926_v14  ;;  %v928_v37 = vmul.f32 1.442695, %v914_v35  ;;  %v915_v55 = vmin.f32 %v2941_v33, 20.0  ;;  %vm1019_vm13 = vcmp.gt.f32.partialorder %v2941_v33, 20.0 }
 0x2c7   : > { %2224 = vpow2.f32 %v928_v37  ;;  %v930_v12 = vmul.f32 1.442695, %v915_v55 }
 0x2c9   : > { %2226 = vpow2.f32 %v930_v12 }
 0x2ca   : > { %v2213_v16 = vpop.eup %2212 }
 0x2cb   : > { %v941_v56 = vadd.f32 1.0, %v2213_v16  ;;  %v944_v62 = vmul.f32 -0.5, %v2213_v16  ;;  %v947_v17 = vand.u32 2147483647, %v2213_v16 }
 0x2cc   : > { %v2215_v13 = vpop.eup %2214 }
 0x2cd   : > { %v2944_v8 = vpop.eup %2216  ;;  %v950_v18 = vadd.f32 1.0, %v2215_v13  ;;  %2228 = vlog2.f32 %v941_v56  ;;  %v953_v26 = vmul.f32 -0.5, %v2215_v13  ;;  %v956_v22 = vand.u32 2147483647, %v2215_v13 }
 0x2ce   : > { %v2946_v44 = vpop.eup %2218  ;;  %v932_v3 = vadd.f32 1.0, %v2944_v8  ;;  %v935_v7 = vmul.f32 -0.5, %v2944_v8  ;;  %v945_v38 = vadd.f32 1.0, %v944_v62  ;;  %v938_v42 = vand.u32 2147483647, %v2944_v8 }
 0x2cf   : > { %v959_v10 = vadd.f32 1.0, %v2946_v44  ;;  %v962_v43 = vmul.f32 -0.5, %v2946_v44  ;;  %v954_v11 = vadd.f32 1.0, %v953_v26  ;;  %vm2963_vm2 = vcmp.lt.f32.partialorder %v956_v22, 0.0004427343 }
 0x2d0   : > { %v936_v32 = vadd.f32 1.0, %v935_v7  ;;  %vm2968_vm3 = vcmp.lt.f32.partialorder %v947_v17, 0.0004427343  ;;  %vm3000_vm9 = vcmp.lt.f32.partialorder %v938_v42, 0.0004427343 }
 0x2d1   : > { %v2221_v61 = vpop.eup %2220  ;;  %2230 = vlog2.f32 %v959_v10  ;;  %v963_v45 = vadd.f32 1.0, %v962_v43  ;;  %v946_v10 = vmul.f32 %v2213_v16, %v945_v38 }
 0x2d2   : > { %v2223_v46 = vpop.eup %2222  ;;  %v968_v41 = vadd.f32 1.0, %v2221_v61  ;;  %2232 = vlog2.f32 %v950_v18  ;;  %v971_v24 = vmul.f32 -0.5, %v2221_v61  ;;  %v974_v31 = vand.u32 2147483647, %v2221_v61 }
 0x2d3   : > { %v977_v40 = vadd.f32 1.0, %v2223_v46  ;;  %v980_v39 = vmul.f32 -0.5, %v2223_v46  ;;  %v2960_v57 = vmul.f32 %v2944_v8, %v936_v32  ;;  %v983_v18 = vand.u32 2147483647, %v2223_v46 }
 0x2d4   : > { %v2950_v19 = vpop.eup %2224  ;;  %2234 = vlog2.f32 %v968_v41  ;;  %v972_v56 = vadd.f32 1.0, %v971_v24  ;;  %v955_v41 = vmul.f32 %v2215_v13, %v954_v11  ;;  %vm2973_vm4 = vcmp.lt.f32.partialorder %v974_v31, 0.0004427343 }
 0x2d5   : > { %v986_v53 = vadd.f32 1.0, %v2950_v19  ;;  %2236 = vlog2.f32 %v977_v40  ;;  %v989_v58 = vmul.f32 -0.5, %v2950_v19  ;;  %v981_v35 = vadd.f32 1.0, %v980_v39 }
 0x2d6   : > { %v2953_v60 = vpop.eup %2226  ;;  %2238 = vlog2.f32 %v932_v3  ;;  %v965_v3 = vand.u32 2147483647, %v2946_v44  ;;  %v992_v26 = vand.u32 2147483647, %v2950_v19  ;;  %v964_v43 = vmul.f32 %v2946_v44, %v963_v45 }
 0x2d7   : > { %2240 = vlog2.f32 %v986_v53  ;;  %v995_v28 = vadd.f32 1.0, %v2953_v60  ;;  %v998_v37 = vmul.f32 -0.5, %v2953_v60  ;;  %v990_v53 = vadd.f32 1.0, %v989_v58 }
 0x2d8   : > { %v1001_v32 = vand.u32 2147483647, %v2953_v60  ;;  %v982_v39 = vmul.f32 %v2223_v46, %v981_v35  ;;  %v973_v11 = vmul.f32 %v2221_v61, %v972_v56  ;;  %vm2980_vm5 = vcmp.lt.f32.partialorder %v983_v18, 0.0004427343 }
 0x2d9   : > { %2242 = vlog2.f32 %v995_v28  ;;  %v999_v17 = vadd.f32 1.0, %v998_v37  ;;  %vm2984_vm6 = vcmp.lt.f32.partialorder %v965_v3, 0.0004427343  ;;  %vm993_vm7 = vcmp.lt.f32.partialorder %v992_v26, 0.0004427343 }
 0x2da   : > { %v2229_v34 = vpop.eup %2228  ;;  %vm1002_vm8 = vcmp.lt.f32.partialorder %v1001_v32, 0.0004427343  ;;  %v2057_v32 = vld [vmem:[%s3590_s4 + $0xa8] sm:$0xff] }
 0x2db   : > { %v943_v24 = vmul.f32 0.6931472, %v2229_v34 }
 0x2de   : > { %v2231_v29 = vpop.eup %2230 }
 0x2df   : > { %v2233_v12 = vpop.eup %2232  ;;  %v961_v7 = vmul.f32 0.6931472, %v2231_v29 }
 0x2e0   : > { %v952_v38 = vmul.f32 0.6931472, %v2233_v12  ;;  %v1000_v12 = vmul.f32 %v2953_v60, %v999_v17  ;;  %v1833_v17 = vld [vmem:[%s3591_s5] sm:$0xff] }
 0x2e1   : > { %v2235_v8 = vpop.eup %2234  ;;  %v967_v46 = vsel %vm2984_vm6, %v964_v43, %v961_v7  ;;  %v1834_v43 = vld [vmem:[%s3591_s5 + $0x8] sm:$0xff] }
 0x2e2   : > { %v2237_v28 = vpop.eup %2236  ;;  %v970_v62 = vmul.f32 0.6931472, %v2235_v8  ;;  %v991_v8 = vmul.f32 %v2950_v19, %v990_v53  ;;  %v949_v19 = vsel %vm2968_vm3, %v946_v10, %v943_v24  ;;  %v958_v56 = vsel %vm2963_vm2, %v955_v41, %v952_v38  ;;  %v1055_v24 = vpop.permute.xlu0 %1054 }
 0x2e3   : > { %v2239_v22 = vpop.eup %2238  ;;  %v979_v16 = vmul.f32 0.6931472, %v2237_v28  ;;  %v1007_v53 = vmul.f32 0.01, %v967_v46  ;;  %v1005_v14 = vmul.f32 0.01, %v949_v19  ;;  %v1060_v38 = vpop.permute.xlu1 %1059 }
 0x2e4   : > { %v2241_v13 = vpop.eup %2240  ;;  %v934_v45 = vmul.f32 0.6931472, %v2239_v22  ;;  %v976_v61 = vsel %vm2973_vm4, %v973_v11, %v970_v62  ;;  %v1006_v10 = vmul.f32 0.01, %v958_v56  ;;  %vm1012_vm2 = vcmp.gt.f32.partialorder %v2899_v59, 20.0  ;;  %v2340_v59 = vld [vmem:[%s3589_s3 + $0x30] sm:$0xff] }
 0x2e5   : > { %v988_v29 = vmul.f32 0.6931472, %v2241_v13  ;;  %v985_v44 = vsel %vm2980_vm5, %v982_v39, %v979_v16  ;;  %v1008_v40 = vmul.f32 0.01, %v976_v61  ;;  %v1023_v62 = vsel %vm1015_vm10, %v2913_v54, %v1007_v53  ;;  %v2050_v22 = vld [vmem:[%s3590_s4 + $0x90] sm:$0xff]  ;;  %v2056_v39 = vld [vmem:[%s3590_s4 + $0xa0] sm:$0xff] }
 0x2e6   : > { %v2243_v34 = vpop.eup %2242  ;;  %v1009_v3 = vmul.f32 0.01, %v985_v44  ;;  %v940_v60 = vsel %vm3000_vm9, %v2960_v57, %v934_v45  ;;  %v1022_v33 = vsel %vm1014_vm1, %v2906_v9, %v1006_v10  ;;  %v2341_v9 = vld [vmem:[%s3589_s3 + $0x28] sm:$0xff]  ;;  %v2058_v16 = vld [vmem:[%s3590_s4 + $0xb0] sm:$0xff]  ;;  %v1045_v11 = vpop.permute.xlu0 %1044 }
 0x2e7   : > { %v994_v35 = vsel %vm993_vm7, %v991_v8, %v988_v29  ;;  %v997_v37 = vmul.f32 0.6931472, %v2243_v34  ;;  %v1004_v57 = vmul.f32 0.01, %v940_v60  ;;  %v1024_v0 = vsel %vm1016_vm14, %v2919_v36, %v1008_v40  ;;  %v2342_v36 = vld [vmem:[%s3589_s3 + $0x38] sm:$0xff]  ;;  %v1835_v13 = vld [vmem:[%s3591_s5 + $0x10] sm:$0xff]  ;;  %v1050_v46 = vpop.permute.xlu1 %1049 }
 0x2e8   : > { %v1010_v18 = vmul.f32 0.01, %v994_v35  ;;  %v1025_v23 = vsel %vm1017_vm12, %v2921_v25, %v1009_v3 }
 0x2e9   : > { %v1003_v28 = vsel %vm1002_vm8, %v1000_v12, %v997_v37  ;;  %v1020_v54 = vsel %vm1012_vm2, %v2896_v4, %v1004_v57  ;;  %v2036_v4 = vld [vmem:[%s3589_s3 + $0x20] sm:$0xff] }
 0x2ea   : > { %v1011_v55 = vmul.f32 0.01, %v1003_v28  ;;  %v1026_v42 = vsel %vm1018_vm11, %v2930_v30, %v1010_v18  ;;  %v1021_v30 = vsel %vm1013_vm15, %v2901_v27, %v1005_v14  ;;  %v1028_v25 = vpack.c.bf16 %v1022_v33, %v1020_v54  ;;  %v2141_v27 = vld [vmem:[%s3587_s1 + $0x28] sm:$0xff]   ;;  %1275 = vperm.xlu1 %2128, %v2036_v4   ;;  %1371 = vperm.xlu0 %2129, %v2036_v4  }
 0x2eb   : > { %v1030_v20 = vpack.c.bf16 %v1026_v42, %v1024_v0  ;;  %v1029_v63 = vpack.c.bf16 %v1023_v62, %v1021_v30 }
 0x2ec   : > { %v1027_v41 = vsel %vm1019_vm13, %v2937_v15, %v1011_v55  ;;  %v2059_v15 = vld [vmem:[%s3590_s4 + $0xb8] sm:$0xff] }
 0x2ed   : > { %v1031_v26 = vpack.c.bf16 %v1027_v41, %v1025_v23 }
 0x2ee   : > { %2130 = vset.pattern.permute.xlu1 %v2405_v1  ;;  %2133 = vset.pattern.permute.xlu0 %v2405_v1 }
 0x2ef   : > { %1090 = vmatprep.subr.bf16.mxu0 %v1031_v26  ;;  %1411 = vperm.xlu1 %2130, %v2340_v59  }
 0x2f0   : > { %1091 = vmatpush1.bf16.msra.mxu0 %v1030_v20  ;;  %1407 = vperm.xlu0 %2133, %v2341_v9  }
 0x2f1   : > { %1092 = vmatprep.subr.bf16.mxu0 %v1029_v63 }
 0x2f3   : > { %1415 = vperm.xlu1 %2130, %v2342_v36  }
 0x2f4   : > { %1093 = vmatpush1.bf16.msra.mxu0 %v1028_v25  ;;  %2135 = vset.pattern.permute.xlu0 %v2407_v5 }
 0x2f5   : > { %1441 = vperm.xlu0 %2135, %v2048_v21  }
 0x2f7   : > { %2034 = vmatmul.mubr.msk.bf16.vlgmr.msra.gmra.mxu0 %vm609_vm0, %v2140_v6  ;;  %2131 = vset.pattern.permute.xlu1 %v2406_v2  ;;  %v2051_v2 = vld [vmem:[%s3590_s4 + $0x98] sm:$0xff] }
 0x2f8   : > { %1120 = vmatprep.mubr.bf16.mxu0 %v2407_v5  ;;  %1375 = vperm.xlu1 %2131, %v2341_v9  }
 0x2f9   : > { %1626 = vperm.xlu0 %2135, %v2059_v15  }
 0x2fc   : > { %2132 = vset.pattern.permute.xlu1 %v2405_v1  ;;  %v2049_v1 = vld [vmem:[%s3590_s4 + $0x88] sm:$0xff] }
 0x2fd   : > { %1616 = vperm.xlu0 %2135, %v2057_v32   ;;  %1403 = vperm.xlu1 %2132, %v2036_v4  }
 0x2ff   : > { %2035 = vmatmul.mubr.msk.bf16.gmra.mxu0 %vm609_vm0, %v2141_v27 }
 0x300   : > { %1677 = vmatprep.mubr.bf16.mxu0 %v2407_v5 }
 0x301   : > { %1843 = vperm.xlu0 %2135, %v1834_v43   ;;  %2134 = vset.pattern.permute.xlu1 %v2407_v5 }
 0x302   : > { %1451 = vperm.xlu1 %2134, %v2050_v22  }
 0x306   : > { %1456 = vperm.xlu1 %2134, %v2051_v2  }
 0x30a   : > { %1446 = vperm.xlu1 %2134, %v2049_v1  }
 0x30e   : > { %1621 = vperm.xlu1 %2134, %v2058_v16  }
 0x312   : > { %1611 = vperm.xlu1 %2134, %v2056_v39  }
 0x316   : > { %1838 = vperm.xlu1 %2134, %v1833_v17  }
 0x31a   : > { %1848 = vperm.xlu1 %2134, %v1835_v13  }
 0x3b7   : > { %v1112_v31 = vpop.f32.mrf.mxu0 }
 0x3b8   : > { %v3084_v58 = vadd.f32 %v1112_v31, %v1045_v11 }
 0x3b9   : > { %v1114_v29 = vpop.f32.mrf.mxu0 }
 0x3ba   : > { %v3087_v8 = vmul.f32 100.0, %v3084_v58  ;;  %v3089_v44 = vadd.f32 %v1114_v29, %v1045_v11 }
 0x3bb   : > { %v1116_v34 = vpop.f32.mrf.mxu0 }
 0x3bc   : > { %v3092_v45 = vmul.f32 100.0, %v3089_v44  ;;  %v3094_v61 = vadd.f32 %v1116_v34, %v1050_v46  ;;  %v1139_v37 = vmin.f32 %v3087_v8, 20.0 }
 0x3bd   : > { %v1118_v35 = vpop.f32.mrf.mxu0 }
 0x3be   : > { %v1140_v12 = vmin.f32 %v3092_v45, 20.0  ;;  %v3099_v19 = vmul.f32 100.0, %v3094_v61  ;;  %v3101_v56 = vadd.f32 %v1118_v35, %v1050_v46  ;;  %v1147_v60 = vmul.f32 1.442695, %v1139_v37 }
 0x3bf   : > { %v1122_v18 = vpop.f32.mrf.mxu0  ;;  %vm1244_vm1 = vcmp.gt.f32.partialorder %v3092_v45, 20.0  ;;  %v2142_v45 = vld [vmem:[%s3587_s1 + $0x30] sm:$0xff]  }
 0x3c0   : > { %v1149_v3 = vmul.f32 1.442695, %v1140_v12  ;;  %v1141_v53 = vmin.f32 %v3099_v19, 20.0  ;;  %v3105_v7 = vmul.f32 100.0, %v3101_v56  ;;  %v3107_v40 = vadd.f32 %v1122_v18, %v1055_v24 }
 0x3c1   : > { %v1124_v28 = vpop.f32.mrf.mxu0  ;;  %vm1245_vm2 = vcmp.gt.f32.partialorder %v3099_v19, 20.0 }
 0x3c2   : > { %2244 = vpow2.f32 %v1149_v3  ;;  %v1151_v55 = vmul.f32 1.442695, %v1141_v53  ;;  %v3109_v14 = vadd.f32 %v1124_v28, %v1055_v24  ;;  %v1142_v10 = vmin.f32 %v3105_v7, 20.0 }
 0x3c3   : > { %v3113_v42 = vmul.f32 100.0, %v3107_v40  ;;  %v1126_v23 = vpop.f32.mrf.mxu0  ;;  %vm1246_vm11 = vcmp.gt.f32.partialorder %v3105_v7, 20.0 }
 0x3c4   : > { %2246 = vpow2.f32 %v1151_v55  ;;  %v3116_v41 = vmul.f32 100.0, %v3109_v14  ;;  %v3118_v62 = vadd.f32 %v1126_v23, %v1060_v38  ;;  %v1153_v57 = vmul.f32 1.442695, %v1142_v10 }
 0x3c5   : > { %v1143_v0 = vmin.f32 %v3113_v42, 20.0  ;;  %v1128_v26 = vpop.f32.mrf.mxu0  ;;  %2248 = vpow2.f32 %v1147_v60  ;;  %vm1247_vm15 = vcmp.gt.f32.partialorder %v3113_v42, 20.0 }
 0x3c6   : > { %v1144_v20 = vmin.f32 %v3116_v41, 20.0  ;;  %v3123_v30 = vmul.f32 100.0, %v3118_v62  ;;  %v3125_v33 = vadd.f32 %v1128_v26, %v1060_v38  ;;  %2250 = vpow2.f32 %v1153_v57 }
 0x3c7   : > { %v1155_v63 = vmul.f32 1.442695, %v1143_v0  ;;  %vm1248_vm13 = vcmp.gt.f32.partialorder %v3116_v41, 20.0 }
 0x3c8   : > { %v1157_v54 = vmul.f32 1.442695, %v1144_v20  ;;  %v1145_v25 = vmin.f32 %v3123_v30, 20.0  ;;  %v3129_v6 = vmul.f32 100.0, %v3125_v33  ;;  %vm1249_vm12 = vcmp.gt.f32.partialorder %v3123_v30, 20.0 }
 0x3c9   : > { %2252 = vpow2.f32 %v1155_v63 }
 0x3ca   : > { %2254 = vpow2.f32 %v1157_v54  ;;  %v1159_v27 = vmul.f32 1.442695, %v1145_v25  ;;  %v1146_v4 = vmin.f32 %v3129_v6, 20.0  ;;  %vm1250_vm14 = vcmp.gt.f32.partialorder %v3129_v6, 20.0 }
 0x3cc   : > { %2256 = vpow2.f32 %v1159_v27  ;;  %v1161_v59 = vmul.f32 1.442695, %v1146_v4 }
 0x3ce   : > { %2258 = vpow2.f32 %v1161_v59 }
 0x3cf   : > { %v2245_v9 = vpop.eup %2244 }
 0x3d0   : > { %v1172_v36 = vadd.f32 1.0, %v2245_v9  ;;  %v1175_v29 = vmul.f32 -0.5, %v2245_v9  ;;  %v1178_v18 = vand.u32 2147483647, %v2245_v9 }
 0x3d1   : > { %v2247_v21 = vpop.eup %2246 }
 0x3d2   : > { %v3132_v15 = vpop.eup %2248  ;;  %v1181_v43 = vadd.f32 1.0, %v2247_v21  ;;  %2260 = vlog2.f32 %v1172_v36  ;;  %v1184_v46 = vmul.f32 -0.5, %v2247_v21  ;;  %v1187_v37 = vand.u32 2147483647, %v2247_v21 }
 0x3d3   : > { %v3134_v32 = vpop.eup %2250  ;;  %v1163_v16 = vadd.f32 1.0, %v3132_v15  ;;  %v1166_v11 = vmul.f32 -0.5, %v3132_v15  ;;  %v1176_v53 = vadd.f32 1.0, %v1175_v29  ;;  %v1169_v57 = vand.u32 2147483647, %v3132_v15 }
 0x3d4   : > { %v1190_v22 = vadd.f32 1.0, %v3134_v32  ;;  %v1193_v35 = vmul.f32 -0.5, %v3134_v32  ;;  %v1185_v28 = vadd.f32 1.0, %v1184_v46  ;;  %vm3151_vm3 = vcmp.lt.f32.partialorder %v1187_v37, 0.0004427343 }
 0x3d5   : > { %v1167_v34 = vadd.f32 1.0, %v1166_v11  ;;  %vm3156_vm4 = vcmp.lt.f32.partialorder %v1178_v18, 0.0004427343  ;;  %v1177_v36 = vmul.f32 %v2245_v9, %v1176_v53  ;;  %vm3188_vm10 = vcmp.lt.f32.partialorder %v1169_v57, 0.0004427343 }
 0x3d6   : > { %v2253_v2 = vpop.eup %2252  ;;  %2262 = vlog2.f32 %v1190_v22  ;;  %v1194_v0 = vadd.f32 1.0, %v1193_v35  ;;  %v1186_v22 = vmul.f32 %v2247_v21, %v1185_v28 }
 0x3d7   : > { %v2255_v1 = vpop.eup %2254  ;;  %v1199_v39 = vadd.f32 1.0, %v2253_v2  ;;  %2264 = vlog2.f32 %v1181_v43  ;;  %v1202_v3 = vmul.f32 -0.5, %v2253_v2  ;;  %v1205_v60 = vand.u32 2147483647, %v2253_v2 }
 0x3d8   : > { %v1208_v17 = vadd.f32 1.0, %v2255_v1  ;;  %v1211_v12 = vmul.f32 -0.5, %v2255_v1  ;;  %v3148_v23 = vmul.f32 %v3132_v15, %v1167_v34  ;;  %v1214_v59 = vand.u32 2147483647, %v2255_v1 }
 0x3d9   : > { %v3138_v24 = vpop.eup %2256  ;;  %2266 = vlog2.f32 %v1199_v39  ;;  %v1203_v4 = vadd.f32 1.0, %v1202_v3  ;;  %v1196_v43 = vand.u32 2147483647, %v3134_v32  ;;  %vm3161_vm5 = vcmp.lt.f32.partialorder %v1205_v60, 0.0004427343 }
 0x3da   : > { %v1217_v13 = vadd.f32 1.0, %v3138_v24  ;;  %2268 = vlog2.f32 %v1208_v17  ;;  %v1220_v55 = vmul.f32 -0.5, %v3138_v24  ;;  %v1212_v63 = vadd.f32 1.0, %v1211_v12 }
 0x3db   : > { %v3141_v38 = vpop.eup %2258  ;;  %2270 = vlog2.f32 %v1163_v16  ;;  %v1195_v46 = vmul.f32 %v3134_v32, %v1194_v0  ;;  %v1204_v3 = vmul.f32 %v2253_v2, %v1203_v4  ;;  %vm3168_vm6 = vcmp.lt.f32.partialorder %v1214_v59, 0.0004427343 }
 0x3dc   : > { %2272 = vlog2.f32 %v1217_v13  ;;  %v1226_v31 = vadd.f32 1.0, %v3141_v38  ;;  %v1229_v54 = vmul.f32 -0.5, %v3141_v38  ;;  %v1221_v39 = vadd.f32 1.0, %v1220_v55 }
 0x3dd   : > { %v1232_v29 = vand.u32 2147483647, %v3141_v38  ;;  %v1213_v35 = vmul.f32 %v2255_v1, %v1212_v63  ;;  %vm3172_vm7 = vcmp.lt.f32.partialorder %v1196_v43, 0.0004427343 }
 0x3de   : > { %2274 = vlog2.f32 %v1226_v31  ;;  %v1223_v31 = vand.u32 2147483647, %v3138_v24  ;;  %v1230_v37 = vadd.f32 1.0, %v1229_v54  ;;  %v1222_v55 = vmul.f32 %v3138_v24, %v1221_v39 }
 0x3df   : > { %v2261_v10 = vpop.eup %2260  ;;  %vm1233_vm9 = vcmp.lt.f32.partialorder %v1232_v29, 0.0004427343 }
 0x3e0   : > { %v1174_v12 = vmul.f32 0.6931472, %v2261_v10  ;;  %vm1224_vm8 = vcmp.lt.f32.partialorder %v1223_v31, 0.0004427343  ;;  %v1231_v54 = vmul.f32 %v3141_v38, %v1230_v37 }
 0x3e2   : > { %v1180_v24 = vsel %vm3156_vm4, %v1177_v36, %v1174_v12 }
 0x3e3   : > { %v2263_v26 = vpop.eup %2262  ;;  %v1236_v20 = vmul.f32 0.01, %v1180_v24 }
 0x3e4   : > { %v2265_v27 = vpop.eup %2264  ;;  %v1192_v17 = vmul.f32 0.6931472, %v2263_v26 }
 0x3e5   : > { %v1183_v18 = vmul.f32 0.6931472, %v2265_v27 }
 0x3e6   : > { %v2267_v15 = vpop.eup %2266  ;;  %v1198_v1 = vsel %vm3172_vm7, %v1195_v46, %v1192_v17 }
 0x3e7   : > { %v2269_v13 = vpop.eup %2268  ;;  %v1201_v11 = vmul.f32 0.6931472, %v2267_v15  ;;  %v1189_v27 = vsel %vm3151_vm3, %v1186_v22, %v1183_v18  ;;  %v1238_v43 = vmul.f32 0.01, %v1198_v1  ;;  %vm1243_vm3 = vcmp.gt.f32.partialorder %v3087_v8, 20.0 }
 0x3e8   : > { %v2271_v34 = vpop.eup %2270  ;;  %v1210_v9 = vmul.f32 0.6931472, %v2269_v13  ;;  %v1237_v36 = vmul.f32 0.01, %v1189_v27 }
 0x3e9   : > { %v2273_v21 = vpop.eup %2272  ;;  %v1165_v0 = vmul.f32 0.6931472, %v2271_v34  ;;  %v1207_v2 = vsel %vm3161_vm5, %v1204_v3, %v1201_v11  ;;  %v1254_v17 = vsel %vm1246_vm11, %v3101_v56, %v1238_v43 }
 0x3ea   : > { %v1219_v60 = vmul.f32 0.6931472, %v2273_v21  ;;  %v1216_v32 = vsel %vm3168_vm6, %v1213_v35, %v1210_v9  ;;  %v1239_v16 = vmul.f32 0.01, %v1207_v2  ;;  %v1253_v6 = vsel %vm1245_vm2, %v3094_v61, %v1237_v36 }
 0x3eb   : > { %v2275_v10 = vpop.eup %2274  ;;  %v1240_v59 = vmul.f32 0.01, %v1216_v32  ;;  %v1171_v38 = vsel %vm3188_vm10, %v3148_v23, %v1165_v0 }
 0x3ec   : > { %v1225_v26 = vsel %vm1224_vm8, %v1222_v55, %v1219_v60  ;;  %v1228_v63 = vmul.f32 0.6931472, %v2275_v10  ;;  %v1235_v23 = vmul.f32 0.01, %v1171_v38  ;;  %v1255_v30 = vsel %vm1247_vm15, %v3107_v40, %v1239_v16  ;;  %v1286_v40 = vpop.permute.xlu0 %1285 }
 0x3ed   : > { %v1241_v4 = vmul.f32 0.01, %v1225_v26  ;;  %v1256_v7 = vsel %vm1248_vm13, %v3109_v14, %v1240_v59 }
 0x3ee   : > { %v1234_v39 = vsel %vm1233_vm9, %v1231_v54, %v1228_v63  ;;  %v1251_v56 = vsel %vm1243_vm3, %v3084_v58, %v1235_v23  ;;  %v3221_v58 = vpop.permute.xlu1 %1290 }
 0x3ef   : > { %v1242_v25 = vmul.f32 0.01, %v1234_v39  ;;  %v1257_v57 = vsel %vm1249_vm12, %v3118_v62, %v1241_v4  ;;  %v1252_v62 = vsel %vm1244_vm1, %v3089_v44, %v1236_v20  ;;  %v1259_v14 = vpack.c.bf16 %v1253_v6, %v1251_v56  ;;  %v2143_v44 = vld [vmem:[%s3587_s1 + $0x38] sm:$0xff]  }
 0x3f0   : > { %v1261_v41 = vpack.c.bf16 %v1257_v57, %v1255_v30  ;;  %v1260_v42 = vpack.c.bf16 %v1254_v17, %v1252_v62  ;;  %v1281_v11 = vpop.permute.xlu0 %1280  ;;  %v1297_v20 = vmul.f32 %v1286_v40, %v2587_v49  ;;  %v1299_v56 = vmul.f32 %v3221_v58, %v2587_v49 }
 0x3f1   : > { %v1258_v22 = vsel %vm1250_vm14, %v3125_v33, %v1242_v25  ;;  %v1295_v60 = vmul.f32 %v1281_v11, %v2587_v49  ;;  %v1296_v26 = vmul.f32 %v1281_v11, %v2589_v50 }
 0x3f2   : > { %v1262_v13 = vpack.c.bf16 %v1258_v22, %v1256_v7  ;;  %v3223_v8 = vpop.permute.xlu1 %1383 }
 0x3f4   : > { %1329 = vmatprep.subr.bf16.mxu1 %v1262_v13  ;;  %v1380_v29 = vpop.permute.xlu0 %1379  ;;  %v1298_v13 = vmul.f32 %v1286_v40, %v2589_v50 }
 0x3f5   : > { %1330 = vmatpush1.bf16.msra.mxu1 %v1261_v41  ;;  %v1390_v36 = vmul.f32 %v1380_v29, %v2583_v47  ;;  %v1391_v41 = vmul.f32 %v1380_v29, %v2585_v48 }
 0x3f6   : > { %1331 = vmatprep.subr.bf16.mxu1 %v1260_v42  ;;  %v1276_v61 = vpop.permute.xlu1 %1275 }
 0x3f7   : > { %v1293_v37 = vmul.f32 %v1276_v61, %v2587_v49  ;;  %v1294_v18 = vmul.f32 %v1276_v61, %v2589_v50 }
 0x3f8   : > { %v1372_v34 = vpop.permute.xlu0 %1371 }
 0x3f9   : > { %1332 = vmatpush1.bf16.msra.mxu1 %v1259_v14  ;;  %v1386_v12 = vmul.f32 %v1372_v34, %v2583_v47  ;;  %v1387_v53 = vmul.f32 %v1372_v34, %v2585_v48  ;;  %v1392_v14 = vmul.f32 %v3223_v8, %v2583_v47 }
 0x3fa   : > { %v1412_v19 = vpop.permute.xlu1 %1411 }
 0x3fb   : > { %v1422_v61 = vmul.f32 %v1412_v19, %v2591_v51 }
 0x3fc   : > { %2046 = vmatmul.mubr.msk.bf16.vlgmr.msra.gmra.mxu1 %vm609_vm0, %v2142_v45  ;;  %v1408_v35 = vpop.permute.xlu0 %1407 }
 0x3fd   : > { %1359 = vmatprep.mubr.bf16.mxu1 %v2407_v5  ;;  %v1420_v27 = vmul.f32 %v1408_v35, %v2591_v51  ;;  %v1421_v57 = vmul.f32 %v1408_v35, %v2593_v52 }
 0x3fe   : > { %v3225_v33 = vpop.permute.xlu1 %1415 }
 0x400   : > { %v1442_v24 = vpop.permute.xlu0 %1441 }
 0x402   : > { %v1376_v31 = vpop.permute.xlu1 %1375 }
 0x403   : > { %v1388_v32 = vmul.f32 %v1376_v31, %v2583_v47  ;;  %v1389_v63 = vmul.f32 %v1376_v31, %v2585_v48 }
 0x404   : > { %2047 = vmatmul.mubr.msk.bf16.gmra.mxu1 %vm609_vm0, %v2143_v44 }
 0x405   : > { %1897 = vmatprep.mubr.bf16.mxu1 %v2407_v5 }
 0x406   : > { %v1404_v46 = vpop.permute.xlu1 %1403 }
 0x407   : > { %v1418_v3 = vmul.f32 %v1404_v46, %v2591_v51  ;;  %v1419_v1 = vmul.f32 %v1404_v46, %v2593_v52  ;;  %v1423_v46 = vmul.f32 %v1412_v19, %v2593_v52 }
 0x40a   : > { %v3227_v9 = vpop.permute.xlu1 %1451 }
 0x40e   : > { %v3237_v10 = vpop.permute.xlu1 %1456 }
 0x412   : > { %v1447_v62 = vpop.permute.xlu1 %1446 }
 0x4bc   : > { %v1351_v21 = vpop.f32.mrf.mxu1 }
 0x4bd   : > { %v1352_v28 = vadd.f32 %v1351_v21, %v1293_v37 }
 0x4be   : > { %v1353_v55 = vpop.f32.mrf.mxu1 }
 0x4bf   : > { %v1394_v0 = vadd.f32 %v1386_v12, %v1352_v28  ;;  %v1354_v2 = vadd.f32 %v1353_v55, %v1294_v18 }
 0x4c0   : > { %v1355_v54 = vpop.f32.mrf.mxu1 }
 0x4c1   : > { %v1395_v4 = vadd.f32 %v1387_v53, %v1354_v2  ;;  %v1356_v59 = vadd.f32 %v1355_v54, %v1295_v60  ;;  %v1426_v43 = vadd.f32 %v1418_v3, %v1394_v0  ;;  %v1300_v3 = vmul.f32 %v3221_v58, %v2589_v50 }
 0x4c2   : > { %v1357_v15 = vpop.f32.mrf.mxu1  ;;  %v1424_v53 = vmul.f32 %v3225_v33, %v2591_v51  ;;  %v1393_v0 = vmul.f32 %v3223_v8, %v2585_v48  ;;  %v1425_v54 = vmul.f32 %v3225_v33, %v2593_v52 }
 0x4c3   : > { %v1396_v16 = vadd.f32 %v1388_v32, %v1356_v59  ;;  %v1427_v39 = vadd.f32 %v1419_v1, %v1395_v4  ;;  %v3242_v38 = vadd.f32 %v1442_v24, %v1426_v43  ;;  %v1358_v25 = vadd.f32 %v1357_v15, %v1296_v26 }
 0x4c4   : > { %v1361_v7 = vpop.f32.mrf.mxu1 }
 0x4c5   : > { %v1428_v22 = vadd.f32 %v1420_v27, %v1396_v16  ;;  %v3247_v17 = vadd.f32 %v1442_v24, %v1427_v39  ;;  %v3250_v23 = vmul.f32 100.0, %v3242_v38  ;;  %v1397_v30 = vadd.f32 %v1389_v63, %v1358_v25 }
 0x4c6   : > { %v1362_v6 = vadd.f32 %v1361_v7, %v1297_v20  ;;  %v1363_v42 = vpop.f32.mrf.mxu1 }
 0x4c7   : > { %v3258_v45 = vadd.f32 %v1447_v62, %v1428_v22  ;;  %v3261_v44 = vmul.f32 100.0, %v3247_v17  ;;  %v1429_v11 = vadd.f32 %v1421_v57, %v1397_v30  ;;  %v1364_v31 = vadd.f32 %v1363_v42, %v1298_v13 }
 0x4c8   : > { %v1398_v40 = vadd.f32 %v1390_v36, %v1362_v6  ;;  %v1365_v29 = vpop.f32.mrf.mxu1  ;;  %v1475_v49 = vmin.f32 %v3250_v23, 20.0 }
 0x4c9   : > { %v3266_v34 = vmul.f32 100.0, %v3258_v45  ;;  %v1476_v47 = vmin.f32 %v3261_v44, 20.0  ;;  %v3270_v35 = vadd.f32 %v1447_v62, %v1429_v11  ;;  %v1399_v12 = vadd.f32 %v1391_v41, %v1364_v31 }
 0x4ca   : > { %v1430_v37 = vadd.f32 %v1422_v61, %v1398_v40  ;;  %v1366_v21 = vadd.f32 %v1365_v29, %v1299_v56  ;;  %v1367_v18 = vpop.f32.mrf.mxu1  ;;  %v1483_v2 = vmul.f32 1.442695, %v1475_v49  ;;  %vm1580_vm2 = vcmp.gt.f32.partialorder %v3261_v44, 20.0  ;;  %v2144_v44 = vld [vmem:[%s3587_s1 + $0x40] sm:$0xff]  }
 0x4cb   : > { %v1477_v19 = vmin.f32 %v3266_v34, 20.0  ;;  %v1485_v28 = vmul.f32 1.442695, %v1476_v47  ;;  %v3278_v60 = vmul.f32 100.0, %v3270_v35  ;;  %v1431_v32 = vadd.f32 %v1423_v46, %v1399_v12 }
 0x4cc   : > { %v3281_v55 = vadd.f32 %v3227_v9, %v1430_v37  ;;  %v1400_v1 = vadd.f32 %v1392_v14, %v1366_v21  ;;  %v1368_v26 = vadd.f32 %v1367_v18, %v1300_v3  ;;  %vm1581_vm3 = vcmp.gt.f32.partialorder %v3266_v34, 20.0 }
 0x4cd   : > { %v1478_v50 = vmin.f32 %v3278_v60, 20.0  ;;  %v3290_v58 = vadd.f32 %v3227_v9, %v1431_v32  ;;  %v1487_v24 = vmul.f32 1.442695, %v1477_v19  ;;  %2276 = vpow2.f32 %v1485_v28 }
 0x4ce   : > { %v3287_v51 = vmul.f32 100.0, %v3281_v55  ;;  %v1432_v63 = vadd.f32 %v1424_v53, %v1400_v1  ;;  %v1401_v27 = vadd.f32 %v1393_v0, %v1368_v26  ;;  %2278 = vpow2.f32 %v1483_v2 }
 0x4cf   : > { %v1489_v4 = vmul.f32 1.442695, %v1478_v50  ;;  %v3296_v8 = vmul.f32 100.0, %v3290_v58  ;;  %vm1582_vm12 = vcmp.gt.f32.partialorder %v3278_v60, 20.0 }
 0x4d0   : > { %v1479_v48 = vmin.f32 %v3287_v51, 20.0  ;;  %v3299_v59 = vadd.f32 %v3237_v10, %v1432_v63  ;;  %v1433_v43 = vadd.f32 %v1425_v54, %v1401_v27  ;;  %vm1583_vm1 = vcmp.gt.f32.partialorder %v3287_v51, 20.0 }
 0x4d1   : > { %2280 = vpow2.f32 %v1489_v4  ;;  %v1480_v15 = vmin.f32 %v3296_v8, 20.0  ;;  %vm1584_vm14 = vcmp.gt.f32.partialorder %v3296_v8, 20.0 }
 0x4d2   : > { %v1491_v9 = vmul.f32 1.442695, %v1479_v48  ;;  %2282 = vpow2.f32 %v1487_v24  ;;  %v3303_v52 = vmul.f32 100.0, %v3299_v59  ;;  %v3306_v33 = vadd.f32 %v3237_v10, %v1433_v43 }
 0x4d3   : > { %v1493_v16 = vmul.f32 1.442695, %v1480_v15 }
 0x4d4   : > { %2284 = vpow2.f32 %v1491_v9  ;;  %v1481_v39 = vmin.f32 %v3303_v52, 20.0  ;;  %v3310_v25 = vmul.f32 100.0, %v3306_v33  ;;  %vm1585_vm13 = vcmp.gt.f32.partialorder %v3303_v52, 20.0 }
 0x4d5   : > { %2286 = vpow2.f32 %v1493_v16 }
 0x4d6   : > { %v1495_v20 = vmul.f32 1.442695, %v1481_v39  ;;  %v1482_v36 = vmin.f32 %v3310_v25, 20.0  ;;  %vm1586_vm15 = vcmp.gt.f32.partialorder %v3310_v25, 20.0 }
 0x4d8   : > { %2288 = vpow2.f32 %v1495_v20  ;;  %v1497_v57 = vmul.f32 1.442695, %v1482_v36 }
 0x4da   : > { %v2277_v7 = vpop.eup %2276  ;;  %2290 = vpow2.f32 %v1497_v57 }
 0x4db   : > { %v3313_v22 = vpop.eup %2278  ;;  %v1508_v10 = vadd.f32 1.0, %v2277_v7  ;;  %v1511_v49 = vmul.f32 -0.5, %v2277_v7  ;;  %v1514_v18 = vand.u32 2147483647, %v2277_v7 }
 0x4dc   : > { %v1499_v14 = vadd.f32 1.0, %v3313_v22  ;;  %v1502_v29 = vmul.f32 -0.5, %v3313_v22  ;;  %v1505_v32 = vand.u32 2147483647, %v3313_v22 }
 0x4dd   : > { %2292 = vlog2.f32 %v1508_v10  ;;  %v1512_v1 = vadd.f32 1.0, %v1511_v49  ;;  %vm3334_vm4 = vcmp.lt.f32.partialorder %v1514_v18, 0.0004427343 }
 0x4de   : > { %v2281_v30 = vpop.eup %2280  ;;  %v1503_v47 = vadd.f32 1.0, %v1502_v29  ;;  %vm3369_vm11 = vcmp.lt.f32.partialorder %v1505_v32, 0.0004427343 }
 0x4df   : > { %v3315_v13 = vpop.eup %2282  ;;  %v1526_v41 = vadd.f32 1.0, %v2281_v30  ;;  %v1529_v37 = vmul.f32 -0.5, %v2281_v30  ;;  %v1532_v63 = vand.u32 2147483647, %v2281_v30 }
 0x4e0   : > { %v1517_v56 = vadd.f32 1.0, %v3315_v13  ;;  %v1520_v3 = vmul.f32 -0.5, %v3315_v13  ;;  %v1523_v53 = vand.u32 2147483647, %v3315_v13  ;;  %v3331_v2 = vmul.f32 %v3313_v22, %v1503_v47 }
 0x4e1   : > { %v3317_v62 = vpop.eup %2284  ;;  %2294 = vlog2.f32 %v1526_v41  ;;  %v1530_v50 = vadd.f32 1.0, %v1529_v37  ;;  %v1513_v22 = vmul.f32 %v2277_v7, %v1512_v1  ;;  %vm3347_vm7 = vcmp.lt.f32.partialorder %v1532_v63, 0.0004427343 }
 0x4e2   : > { %v1535_v6 = vadd.f32 1.0, %v3317_v62  ;;  %v2287_v42 = vpop.eup %2286  ;;  %v1538_v21 = vmul.f32 -0.5, %v3317_v62  ;;  %v1521_v9 = vadd.f32 1.0, %v1520_v3  ;;  %vm3338_vm5 = vcmp.lt.f32.partialorder %v1523_v53, 0.0004427343 }
 0x4e3   : > { %v1544_v61 = vadd.f32 1.0, %v2287_v42  ;;  %v1547_v12 = vmul.f32 -0.5, %v2287_v42  ;;  %v1550_v26 = vand.u32 2147483647, %v2287_v42  ;;  %v1541_v16 = vand.u32 2147483647, %v3317_v62 }
 0x4e4   : > { %2296 = vlog2.f32 %v1535_v6  ;;  %v1539_v4 = vadd.f32 1.0, %v1538_v21 }
 0x4e5   : > { %v2289_v11 = vpop.eup %2288  ;;  %2298 = vlog2.f32 %v1544_v61  ;;  %v1548_v24 = vadd.f32 1.0, %v1547_v12  ;;  %vm3343_vm6 = vcmp.lt.f32.partialorder %v1550_v26, 0.0004427343  ;;  %vm3355_vm8 = vcmp.lt.f32.partialorder %v1541_v16, 0.0004427343 }
 0x4e6   : > { %2300 = vlog2.f32 %v1517_v56  ;;  %v1553_v40 = vadd.f32 1.0, %v2289_v11  ;;  %v1556_v19 = vmul.f32 -0.5, %v2289_v11  ;;  %v1559_v57 = vand.u32 2147483647, %v2289_v11 }
 0x4e7   : > { %2302 = vlog2.f32 %v1499_v14  ;;  %v3322_v31 = vpop.eup %2290  ;;  %v1531_v14 = vmul.f32 %v2281_v30, %v1530_v50  ;;  %v1549_v29 = vmul.f32 %v2287_v42, %v1548_v24  ;;  %v1540_v49 = vmul.f32 %v3317_v62, %v1539_v4 }
 0x4e8   : > { %2304 = vlog2.f32 %v1553_v40  ;;  %v1562_v46 = vadd.f32 1.0, %v3322_v31  ;;  %v1565_v27 = vmul.f32 -0.5, %v3322_v31  ;;  %v1557_v39 = vadd.f32 1.0, %v1556_v19 }
 0x4e9   : > { %v1568_v7 = vand.u32 2147483647, %v3322_v31  ;;  %vm1560_vm9 = vcmp.lt.f32.partialorder %v1559_v57, 0.0004427343  ;;  %v1522_v62 = vmul.f32 %v3315_v13, %v1521_v9 }
 0x4ea   : > { %2306 = vlog2.f32 %v1562_v46  ;;  %v2293_v28 = vpop.eup %2292  ;;  %v1566_v46 = vadd.f32 1.0, %v1565_v27  ;;  %v1558_v21 = vmul.f32 %v2289_v11, %v1557_v39 }
 0x4eb   : > { %v1510_v47 = vmul.f32 0.6931472, %v2293_v28  ;;  %vm1569_vm10 = vcmp.lt.f32.partialorder %v1568_v7, 0.0004427343 }
 0x4ec   : > { %v1567_v1 = vmul.f32 %v3322_v31, %v1566_v46 }
 0x4ed   : > { %v1516_v26 = vsel %vm3334_vm4, %v1513_v22, %v1510_v47  ;;  %vm1579_vm4 = vcmp.gt.f32.partialorder %v3250_v23, 20.0  ;;  %v1622_v23 = vpop.permute.xlu1 %1621 }
 0x4ee   : > { %v2295_v0 = vpop.eup %2294  ;;  %v1572_v48 = vmul.f32 0.01, %v1516_v26 }
 0x4ef   : > { %v1528_v10 = vmul.f32 0.6931472, %v2295_v0 }
 0x4f0   : > { %v1588_v25 = vsel %vm1580_vm2, %v3247_v17, %v1572_v48  ;;  %v2145_v17 = vld [vmem:[%s3587_s1 + $0x48] sm:$0xff]  }
 0x4f1   : > { %v2297_v54 = vpop.eup %2296  ;;  %v1534_v42 = vsel %vm3347_vm7, %v1531_v14, %v1528_v10 }
 0x4f2   : > { %v2299_v43 = vpop.eup %2298  ;;  %v1537_v56 = vmul.f32 0.6931472, %v2297_v54  ;;  %v1574_v54 = vmul.f32 0.01, %v1534_v42 }
 0x4f3   : > { %v2301_v20 = vpop.eup %2300  ;;  %v1546_v36 = vmul.f32 0.6931472, %v2299_v43 }
 0x4f4   : > { %v2303_v41 = vpop.eup %2302  ;;  %v1519_v37 = vmul.f32 0.6931472, %v2301_v20  ;;  %v1543_v19 = vsel %vm3355_vm8, %v1540_v49, %v1537_v56  ;;  %v1590_v15 = vsel %vm1582_vm12, %v3270_v35, %v1574_v54 }
 0x4f5   : > { %v2305_v40 = vpop.eup %2304  ;;  %v1552_v18 = vsel %vm3343_vm6, %v1549_v29, %v1546_v36  ;;  %v1501_v53 = vmul.f32 0.6931472, %v2303_v41  ;;  %v1575_v27 = vmul.f32 0.01, %v1543_v19  ;;  %v1596_v51 = vpack.c.bf16 %v1590_v15, %v1588_v25 }
 0x4f6   : > { %v1555_v12 = vmul.f32 0.6931472, %v2305_v40  ;;  %v1525_v50 = vsel %vm3338_vm5, %v1522_v62, %v1519_v37  ;;  %v1576_v63 = vmul.f32 0.01, %v1552_v18 }
 0x4f7   : > { %v2307_v3 = vpop.eup %2306  ;;  %v1507_v31 = vsel %vm3369_vm11, %v3331_v2, %v1501_v53  ;;  %v1573_v43 = vmul.f32 0.01, %v1525_v50  ;;  %v1591_v16 = vsel %vm1583_vm1, %v3281_v55, %v1575_v27 }
 0x4f8   : > { %v1561_v28 = vsel %vm1560_vm9, %v1558_v21, %v1555_v12  ;;  %v1564_v11 = vmul.f32 0.6931472, %v2307_v3  ;;  %v1592_v9 = vsel %vm1584_vm14, %v3290_v58, %v1576_v63  ;;  %v1571_v2 = vmul.f32 0.01, %v1507_v31 }
 0x4f9   : > { %v1577_v0 = vmul.f32 0.01, %v1561_v28 }
 0x4fa   : > { %v1570_v13 = vsel %vm1569_vm10, %v1567_v1, %v1564_v11  ;;  %v1587_v35 = vsel %vm1579_vm4, %v3242_v38, %v1571_v2  ;;  %v1612_v38 = vpop.permute.xlu1 %1611 }
 0x4fb   : > { %v1578_v4 = vmul.f32 0.01, %v1570_v13  ;;  %v1593_v32 = vsel %vm1585_vm13, %v3299_v59, %v1577_v0  ;;  %v1589_v59 = vsel %vm1581_vm3, %v3258_v45, %v1573_v43  ;;  %v1627_v45 = vpop.permute.xlu0 %1626 }
 0x4fc   : > { %v1597_v8 = vpack.c.bf16 %v1593_v32, %v1591_v16  ;;  %v1595_v58 = vpack.c.bf16 %v1589_v59, %v1587_v35 }
 0x4fd   : > { %v1594_v60 = vsel %vm1586_vm15, %v3306_v33, %v1578_v4 }
 0x4fe   : > { %v1598_v52 = vpack.c.bf16 %v1594_v60, %v1592_v9 }
 0x4ff   : > { %v1617_v36 = vpop.permute.xlu0 %1616 }
 0x500   : > { %1657 = vmatprep.subr.bf16.mxu0 %v1598_v52 }
 0x501   : > { %1658 = vmatpush1.bf16.msra.mxu0 %v1597_v8 }
 0x502   : > { %1659 = vmatprep.subr.bf16.mxu0 %v1596_v51 }
 0x505   : > { %1660 = vmatpush1.bf16.msra.mxu0 %v1595_v58 }
 0x508   : > { %2062 = vmatmul.mubr.msk.bf16.vlgmr.msra.gmra.mxu0 %vm609_vm0, %v2144_v44 }
 0x509   : > { %1687 = vmatprep.mubr.bf16.mxu0 %v2407_v5 }
 0x510   : > { %2063 = vmatmul.mubr.msk.bf16.gmra.mxu0 %vm609_vm0, %v2145_v17 }
 0x5c8   : > { %v1679_v34 = vpop.f32.mrf.mxu0 }
 0x5c9   : > { %v3401_v55 = vadd.f32 %v1679_v34, %v1612_v38 }
 0x5ca   : > { %v1681_v33 = vpop.f32.mrf.mxu0 }
 0x5cb   : > { %v3404_v39 = vmul.f32 100.0, %v3401_v55  ;;  %v3406_v20 = vadd.f32 %v1681_v33, %v1612_v38 }
 0x5cc   : > { %v1683_v57 = vpop.f32.mrf.mxu0 }
 0x5cd   : > { %v3409_v22 = vmul.f32 100.0, %v3406_v20  ;;  %v3411_v10 = vadd.f32 %v1683_v57, %v1617_v36  ;;  %v1706_v6 = vmin.f32 %v3404_v39, 20.0 }
 0x5ce   : > { %v1685_v41 = vpop.f32.mrf.mxu0 }
 0x5cf   : > { %v1707_v56 = vmin.f32 %v3409_v22, 20.0  ;;  %v3416_v14 = vmul.f32 100.0, %v3411_v10  ;;  %v3418_v61 = vadd.f32 %v1685_v41, %v1617_v36  ;;  %v1714_v7 = vmul.f32 1.442695, %v1706_v6 }
 0x5d0   : > { %v1689_v40 = vpop.f32.mrf.mxu0  ;;  %vm1811_vm3 = vcmp.gt.f32.partialorder %v3409_v22, 20.0 }
 0x5d1   : > { %v1716_v29 = vmul.f32 1.442695, %v1707_v56  ;;  %v1708_v46 = vmin.f32 %v3416_v14, 20.0  ;;  %v3422_v49 = vmul.f32 100.0, %v3418_v61  ;;  %v3424_v47 = vadd.f32 %v1689_v40, %v1622_v23 }
 0x5d2   : > { %v1691_v37 = vpop.f32.mrf.mxu0  ;;  %vm1812_vm4 = vcmp.gt.f32.partialorder %v3416_v14, 20.0 }
 0x5d3   : > { %2308 = vpow2.f32 %v1716_v29  ;;  %v1718_v12 = vmul.f32 1.442695, %v1708_v46  ;;  %v3426_v21 = vadd.f32 %v1691_v37, %v1622_v23  ;;  %v1709_v18 = vmin.f32 %v3422_v49, 20.0 }
 0x5d4   : > { %v3430_v30 = vmul.f32 100.0, %v3424_v47  ;;  %v1693_v42 = vpop.f32.mrf.mxu0  ;;  %vm1813_vm13 = vcmp.gt.f32.partialorder %v3422_v49, 20.0 }
 0x5d5   : > { %2310 = vpow2.f32 %v1718_v12  ;;  %v3433_v3 = vmul.f32 100.0, %v3426_v21  ;;  %v3435_v53 = vadd.f32 %v1693_v42, %v1627_v45  ;;  %v1720_v62 = vmul.f32 1.442695, %v1709_v18 }
 0x5d6   : > { %v1710_v19 = vmin.f32 %v3430_v30, 20.0  ;;  %v1695_v28 = vpop.f32.mrf.mxu0  ;;  %2312 = vpow2.f32 %v1714_v7  ;;  %vm1814_vm2 = vcmp.gt.f32.partialorder %v3430_v30, 20.0 }
 0x5d7   : > { %v1711_v11 = vmin.f32 %v3433_v3, 20.0  ;;  %v3440_v1 = vmul.f32 100.0, %v3435_v53  ;;  %v3442_v0 = vadd.f32 %v1695_v28, %v1627_v45  ;;  %2314 = vpow2.f32 %v1720_v62 }
 0x5d8   : > { %v1722_v26 = vmul.f32 1.442695, %v1710_v19  ;;  %vm1815_vm15 = vcmp.gt.f32.partialorder %v3433_v3, 20.0 }
 0x5d9   : > { %v1724_v50 = vmul.f32 1.442695, %v1711_v11  ;;  %v1712_v63 = vmin.f32 %v3440_v1, 20.0  ;;  %v3446_v54 = vmul.f32 100.0, %v3442_v0  ;;  %vm1816_vm14 = vcmp.gt.f32.partialorder %v3440_v1, 20.0 }
 0x5da   : > { %2316 = vpow2.f32 %v1722_v26 }
 0x5db   : > { %2318 = vpow2.f32 %v1724_v50  ;;  %v1726_v24 = vmul.f32 1.442695, %v1712_v63  ;;  %v1713_v13 = vmin.f32 %v3446_v54, 20.0  ;;  %vm1817_vm1 = vcmp.gt.f32.partialorder %v3446_v54, 20.0  ;;  %v1844_v54 = vpop.permute.xlu0 %1843 }
 0x5dd   : > { %2320 = vpow2.f32 %v1726_v24  ;;  %v1728_v27 = vmul.f32 1.442695, %v1713_v13 }
 0x5df   : > { %2322 = vpow2.f32 %v1728_v27 }
 0x5e0   : > { %v2309_v31 = vpop.eup %2308 }
 0x5e1   : > { %v1739_v48 = vadd.f32 1.0, %v2309_v31  ;;  %v1742_v44 = vmul.f32 -0.5, %v2309_v31  ;;  %v1745_v33 = vand.u32 2147483647, %v2309_v31 }
 0x5e2   : > { %v2311_v4 = vpop.eup %2310 }
 0x5e3   : > { %v3449_v43 = vpop.eup %2312  ;;  %v1748_v9 = vadd.f32 1.0, %v2311_v4  ;;  %2324 = vlog2.f32 %v1739_v48  ;;  %v1751_v17 = vmul.f32 -0.5, %v2311_v4  ;;  %v1754_v38 = vand.u32 2147483647, %v2311_v4 }
 0x5e4   : > { %v3451_v32 = vpop.eup %2314  ;;  %v1730_v52 = vadd.f32 1.0, %v3449_v43  ;;  %v1733_v35 = vmul.f32 -0.5, %v3449_v43  ;;  %v1743_v57 = vadd.f32 1.0, %v1742_v44  ;;  %v1736_v46 = vand.u32 2147483647, %v3449_v43 }
 0x5e5   : > { %v1757_v60 = vadd.f32 1.0, %v3451_v32  ;;  %v1760_v45 = vmul.f32 -0.5, %v3451_v32  ;;  %v1752_v41 = vadd.f32 1.0, %v1751_v17  ;;  %vm3468_vm5 = vcmp.lt.f32.partialorder %v1754_v38, 0.0004427343 }
 0x5e6   : > { %v1734_v23 = vadd.f32 1.0, %v1733_v35  ;;  %vm3473_vm6 = vcmp.lt.f32.partialorder %v1745_v33, 0.0004427343  ;;  %v1744_v26 = vmul.f32 %v2309_v31, %v1743_v57  ;;  %v1763_v50 = vand.u32 2147483647, %v3451_v32 }
 0x5e7   : > { %v2317_v15 = vpop.eup %2316  ;;  %2326 = vlog2.f32 %v1757_v60  ;;  %v1761_v37 = vadd.f32 1.0, %v1760_v45  ;;  %v1753_v24 = vmul.f32 %v2311_v4, %v1752_v41  ;;  %vm3505_vm12 = vcmp.lt.f32.partialorder %v1736_v46, 0.0004427343 }
 0x5e8   : > { %v2319_v2 = vpop.eup %2318  ;;  %v1766_v16 = vadd.f32 1.0, %v2317_v15  ;;  %2328 = vlog2.f32 %v1748_v9  ;;  %v1769_v36 = vmul.f32 -0.5, %v2317_v15  ;;  %v1772_v6 = vand.u32 2147483647, %v2317_v15 }
 0x5e9   : > { %v1775_v8 = vadd.f32 1.0, %v2319_v2  ;;  %v1778_v34 = vmul.f32 -0.5, %v2319_v2  ;;  %v3465_v29 = vmul.f32 %v3449_v43, %v1734_v23  ;;  %v1781_v11 = vand.u32 2147483647, %v2319_v2 }
 0x5ea   : > { %v3455_v25 = vpop.eup %2320  ;;  %2330 = vlog2.f32 %v1766_v16  ;;  %v1770_v28 = vadd.f32 1.0, %v1769_v36  ;;  %vm3478_vm7 = vcmp.lt.f32.partialorder %v1772_v6, 0.0004427343  ;;  %v1762_v16 = vmul.f32 %v3451_v32, %v1761_v37 }
 0x5eb   : > { %v1784_v59 = vadd.f32 1.0, %v3455_v25  ;;  %2332 = vlog2.f32 %v1775_v8  ;;  %v1787_v56 = vmul.f32 -0.5, %v3455_v25  ;;  %v1779_v18 = vadd.f32 1.0, %v1778_v34 }
 0x5ec   : > { %v3458_v51 = vpop.eup %2322  ;;  %2334 = vlog2.f32 %v1730_v52  ;;  %v1790_v60 = vand.u32 2147483647, %v3455_v25  ;;  %v1771_v17 = vmul.f32 %v2317_v15, %v1770_v28  ;;  %vm3485_vm8 = vcmp.lt.f32.partialorder %v1781_v11, 0.0004427343 }
 0x5ed   : > { %2336 = vlog2.f32 %v1784_v59  ;;  %v1793_v58 = vadd.f32 1.0, %v3458_v51  ;;  %v1796_v42 = vmul.f32 -0.5, %v3458_v51  ;;  %v1788_v27 = vadd.f32 1.0, %v1787_v56 }
 0x5ee   : > { %v1799_v52 = vand.u32 2147483647, %v3458_v51  ;;  %v1780_v59 = vmul.f32 %v2319_v2, %v1779_v18  ;;  %vm3489_vm9 = vcmp.lt.f32.partialorder %v1763_v50, 0.0004427343  ;;  %vm1791_vm10 = vcmp.lt.f32.partialorder %v1790_v60, 0.0004427343 }
 0x5ef   : > { %2338 = vlog2.f32 %v1793_v58  ;;  %v1797_v35 = vadd.f32 1.0, %v1796_v42  ;;  %v1789_v34 = vmul.f32 %v3455_v25, %v1788_v27 }
 0x5f0   : > { %v2325_v40 = vpop.eup %2324  ;;  %vm1800_vm11 = vcmp.lt.f32.partialorder %v1799_v52, 0.0004427343 }
 0x5f1   : > { %v1741_v58 = vmul.f32 0.6931472, %v2325_v40  ;;  %v1798_v6 = vmul.f32 %v3458_v51, %v1797_v35 }
 0x5f3   : > { %v1747_v25 = vsel %vm3473_vm6, %v1744_v26, %v1741_v58 }
 0x5f4   : > { %v2327_v7 = vpop.eup %2326  ;;  %v1803_v12 = vmul.f32 0.01, %v1747_v25 }
 0x5f5   : > { %v2329_v19 = vpop.eup %2328  ;;  %v1759_v48 = vmul.f32 0.6931472, %v2327_v7 }
 0x5f6   : > { %v1750_v44 = vmul.f32 0.6931472, %v2329_v19 }
 0x5f7   : > { %v2331_v63 = vpop.eup %2330  ;;  %v1765_v2 = vsel %vm3489_vm9, %v1762_v16, %v1759_v48 }
 0x5f8   : > { %v2333_v43 = vpop.eup %2332  ;;  %v1768_v9 = vmul.f32 0.6931472, %v2331_v63  ;;  %v1756_v56 = vsel %vm3468_vm5, %v1753_v24, %v1750_v44  ;;  %v1805_v7 = vmul.f32 0.01, %v1765_v2  ;;  %vm1810_vm5 = vcmp.gt.f32.partialorder %v3404_v39, 20.0 }
 0x5f9   : > { %v2335_v8 = vpop.eup %2334  ;;  %v1777_v31 = vmul.f32 0.6931472, %v2333_v43  ;;  %v1804_v28 = vmul.f32 0.01, %v1756_v56 }
 0x5fa   : > { %v2337_v4 = vpop.eup %2336  ;;  %v1732_v36 = vmul.f32 0.6931472, %v2335_v8  ;;  %v1774_v15 = vsel %vm3478_vm7, %v1771_v17, %v1768_v9  ;;  %v1821_v26 = vsel %vm1813_vm13, %v3418_v61, %v1805_v7 }
 0x5fb   : > { %v1786_v38 = vmul.f32 0.6931472, %v2337_v4  ;;  %v1783_v32 = vsel %vm3485_vm8, %v1780_v59, %v1777_v31  ;;  %v1806_v42 = vmul.f32 0.01, %v1774_v15  ;;  %v1820_v30 = vsel %vm1812_vm4, %v3411_v10, %v1804_v28 }
 0x5fc   : > { %v2339_v33 = vpop.eup %2338  ;;  %v1807_v37 = vmul.f32 0.01, %v1783_v32  ;;  %v1738_v51 = vsel %vm3505_vm12, %v3465_v29, %v1732_v36 }
 0x5fd   : > { %v1792_v57 = vsel %vm1791_vm10, %v1789_v34, %v1786_v38  ;;  %v1795_v41 = vmul.f32 0.6931472, %v2339_v33  ;;  %v1802_v29 = vmul.f32 0.01, %v1738_v51  ;;  %v1822_v1 = vsel %vm1814_vm2, %v3424_v47, %v1806_v42  ;;  %v2146_v47 = vld [vmem:[%s3588_s2] sm:$0xff]  }
 0x5fe   : > { %v1808_v40 = vmul.f32 0.01, %v1792_v57  ;;  %v1823_v49 = vsel %vm1815_vm15, %v3426_v21, %v1807_v37 }
 0x5ff   : > { %v1801_v19 = vsel %vm1800_vm11, %v1798_v6, %v1795_v41  ;;  %v1818_v61 = vsel %vm1810_vm5, %v3401_v55, %v1802_v29  ;;  %v1839_v55 = vpop.permute.xlu1 %1838 }
 0x600   : > { %v1809_v62 = vmul.f32 0.01, %v1801_v19  ;;  %v1824_v46 = vsel %vm1816_vm14, %v3435_v53, %v1808_v40  ;;  %v1819_v53 = vsel %vm1811_vm3, %v3406_v20, %v1803_v12  ;;  %v1826_v22 = vpack.c.bf16 %v1820_v30, %v1818_v61  ;;  %v2147_v20 = vld [vmem:[%s3588_s2 + $0x8] ss:$0 sps:$4 sm:$0xff]  }
 0x601   : > { %v1828_v3 = vpack.c.bf16 %v1824_v46, %v1822_v1  ;;  %v1827_v21 = vpack.c.bf16 %v1821_v26, %v1819_v53 }
 0x602   : > { %v1825_v11 = vsel %vm1817_vm1, %v3442_v0, %v1809_v62 }
 0x603   : > { %v1829_v50 = vpack.c.bf16 %v1825_v11, %v1823_v49  ;;  %v1849_v27 = vpop.permute.xlu1 %1848 }
 0x605   : > { %1877 = vmatprep.subr.bf16.mxu1 %v1829_v50 }
 0x606   : > { %1878 = vmatpush1.bf16.msra.mxu1 %v1828_v3 }
 0x607   : > { %1879 = vmatprep.subr.bf16.mxu1 %v1827_v21 }
 0x60a   : > { %1880 = vmatpush1.bf16.msra.mxu1 %v1826_v22 }
 0x60d   : > { %2066 = vmatmul.mubr.msk.bf16.vlgmr.msra.gmra.mxu1 %vm609_vm0, %v2146_v47 }
 0x60e   : > { %1907 = vmatprep.mubr.bf16.mxu1 %v2407_v5 }
 0x615   : > { %2067 = vmatmul.mubr.msk.bf16.gmra.mxu1 %vm609_vm0, %v2147_v20 }
 0x6cd   : > { %v1899_v39 = vpop.f32.mrf.mxu1 }
 0x6ce   : > { %v1900_v10 = vadd.f32 %v1899_v39, %v1839_v55 }
 0x6cf   : > { %v1901_v14 = vpop.f32.mrf.mxu1 }
 0x6d0   : > { %1916 = vst [vmem:[%s245_s11] sm:$0xff] %v1900_v10  ;;  %v1902_v0 = vadd.f32 %v1901_v14, %v1839_v55 }
 0x6d1   : > { %v1903_v63 = vpop.f32.mrf.mxu1 }
 0x6d2   : > { %1917 = vst [vmem:[%s245_s11 + $0x8] sm:$0xff] %v1902_v0  ;;  %v1904_v5 = vadd.f32 %v1903_v63, %v1844_v54 }
 0x6d3   : > { %v1905_v24 = vpop.f32.mrf.mxu1 }
 0x6d4   : > { %1918 = vst [vmem:[%s245_s11 + $0x10] sm:$0xff] %v1904_v5  ;;  %v1906_v13 = vadd.f32 %v1905_v24, %v1844_v54 }
 0x6d5   : > { %v1909_v48 = vpop.f32.mrf.mxu1 }
 0x6d6   : > { %1919 = vst [vmem:[%s245_s11 + $0x18] sm:$0xff] %v1906_v13  ;;  %v1910_v43 = vadd.f32 %v1909_v48, %v1849_v27 }
 0x6d7   : > { %v1911_v9 = vpop.f32.mrf.mxu1 }
 0x6d8   : > { %1920 = vst [vmem:[%s245_s11 + $0x20] sm:$0x1] %v1910_v43  ;;  %v1912_v60 = vadd.f32 %v1911_v9, %v1849_v27 }
 0x6d9   : > { %v1913_v52 = vpop.f32.mrf.mxu1 }
 0x6da   : > { %1921 = vst [vmem:[%s245_s11 + $0x28] sm:$0x1] %v1912_v60 }
 0x6db   : > { %v1914_v16 = vpop.f32.mrf.mxu1 }
 0x6dc   : > { %2356 = shalt.err (!%p2353_p3)
}
 0x6dd   : > { %s2357_s26 = scalar_lea.hbm %s3544_s16, 768  ;;  %s2361_s9 = scalar_lea.hbm %s3592_s6, 3072 }
 0x6de   : > { %p2358_p4 = scmp.ne.s32.totalorder %s3544_s16, %s2357_s26  ;;  %p2362_p9 = scmp.lt.s32.totalorder %s3544_s16, %s3592_s6 }
 0x6df   : > { %p2363_p10 = scmp.lt.s32.totalorder %s2361_s9, %s2357_s26 }
 0x6e0   : > { %p2359_p7 = pnand %p2358_p4, %p2485_p5 }
 0x6e1   : > { %p2364_p11 = por %p2363_p10, %p2362_p9 }
 0x6e2   : > { %p2360_p8 = pneg %p2359_p7 }
 0x6e4   : > { %p2365_p12 = pnand %p2364_p11, %p2360_p8 }
 0x6e6   : > { %2368 = shalt.err (!%p2365_p12)
}
 0x6e7   : > { %s2409_s13 = smov 256   ;;  %s2410_s14 = smov 1024  }
 0x6e8   : > { %s2411_s15 = smov 16  }
 0x6e9   : > { %2074 = dma.vmem_to_hbm [thread:$0]  (%p2485_p5), %s3539_s12, 768, %s3544_s16, %s3546_s25, %s2409_s13, %s2410_s14, %s2411_s15  }
 0x6ea PF: > { %p2080_p13 = scmp.ge.s32.totalorder %s2403_s24, 2  ;;  %s1951_s17 = sand.u32 1, %s2391_s21  }
 0x6eb   : > { %s1952_s18 = scalar_lea.sflag [#allocation3], %s1951_s17 }
 0x6ec   : > { %p2077_p0 = pnand %p2080_p13, %p2489_p6 }
 0x6ee   : > { %p2078_p1 = pneg %p2077_p0 }
 0x6f0   : > { %2386 = dma.done.wait (%p2078_p1), %s1952_s18, 768  }
 0x6f1   : > { %2388 = vsyncadd (%p2078_p1), %s1952_s18, 4294966528  ;;  %p16_p2 = scmp.ge.s32.totalorder %s2472_s27, 6   ;;  %s3665_s21 = smov %s2395_s22 }
 0x6f2   : > { %s3666_s22 = smov %s2399_s23  ;;  %s3667_s23 = smov %s2483_s30 }
 0x6f3   : > { %s3668_s24 = smov %s2472_s27  ;;  %18 = sbr.rel (!%p16_p2) target bundleno = 3 (0x3), region = 89 }
 0x6f8   :  { %1957 = vsyncpa [#allocation3], 1 }
 0x6f9   :  { %1959 = vsyncpa [#allocation3 + $0x1], 1 }

</bundles_post_ra>
